<compile_context>
chip_gen: v7x
topology: tpu7x:2x2x1
jax: 0.10.0
libtpu: 0.0.40
codegen_flags: <defaults>
</compile_context>

<pallas_src>
import jax
import jax.numpy as jnp
from jax.experimental import pallas as pl
from jax.experimental.pallas import tpu as pltpu

NUM_SPECIES = 4                       # H, C, N, O
AEV_DIM = 384                         # 64 radial + 320 angular (ANI-1x)
H1MAX, H2MAX, H3MAX = 160, 128, 96    # padded (max) hidden dims
# true per-species hidden sizes of the ANI-1x atomic networks (H, C, N, O)
SPECIES_DIMS = [(160, 128, 96), (144, 112, 96), (128, 112, 96), (128, 112, 96)]
CELU_ALPHA = 0.1
_CELU_INV_ALPHA = 1.0 / CELU_ALPHA


def _celu(x):
    # torch.nn.CELU(alpha=0.1), restructured: max(x,0) + a*(exp(min(x,0)/a)-1)
    # (no compare+select; exp argument <= 0 so it never overflows)
    return jnp.maximum(x, 0) + CELU_ALPHA * (
        jnp.exp(jnp.minimum(x, 0) * _CELU_INV_ALPHA) - 1.0)


def species_onehot(species):
    """(B, A) int32 in {-1, 0..3}  ->  (B, A, 4) float32 one-hot (0 for padding)."""
    valid = species >= 0
    oh = (species[..., None] == jnp.arange(NUM_SPECIES)) & valid[..., None]
    return oh.astype(jnp.float32)


def compute_aev(species, coords):
    """ANI-1x style AEVs. species (B,A) int32, coords (B,A,3) f32 -> (B,A,384) f32."""
    B, A = species.shape
    Rcr, Rca = 5.2, 3.5
    EtaR = 16.0
    ShfR = jnp.linspace(0.9, Rcr, 17)[:-1]                               # (16,)
    EtaA, Zeta = 8.0, 32.0
    ShfA = jnp.linspace(0.9, Rca, 5)[:-1]                                # (4,)
    ShfZ = (jnp.arange(8, dtype=jnp.float32) + 0.5) * (jnp.pi / 8.0)     # (8,)

    valid = species >= 0
    oh = species_onehot(species)                                         # (B,A,4)

    vec = coords[:, None, :, :] - coords[:, :, None, :]                  # (B,A,A,3)
    d = jnp.sqrt(jnp.sum(vec * vec, axis=-1) + 1e-12)                    # (B,A,A)

    eye = jnp.eye(A, dtype=bool)
    pair_mask = (valid[:, :, None] & valid[:, None, :] & (~eye)[None]).astype(
        jnp.float32)                                                     # (B,A,A)

    # --- radial part ---
    fc_r = jnp.where(d < Rcr, 0.5 * jnp.cos(jnp.pi * d / Rcr) + 0.5, 0.0)
    rad = 0.25 * jnp.exp(-EtaR * (d[..., None] - ShfR) ** 2) * fc_r[..., None]
    rad = rad * pair_mask[..., None]                                     # (B,A,A,16)
    g_rad = jnp.einsum("bijr,bjs->bisr", rad, oh).reshape(B, A, NUM_SPECIES * 16)

    # --- angular part ---
    # TODO(synk): O(A^3) dense term tensor; fine for toy A, restructure for real A.
    fc_a = jnp.where(d < Rca, 0.5 * jnp.cos(jnp.pi * d / Rca) + 0.5, 0.0)
    dot_jk = jnp.einsum("bijc,bikc->bijk", vec, vec)                     # (B,A,A,A)
    cos_t = 0.95 * dot_jk / (d[:, :, :, None] * d[:, :, None, :] + 1e-12)
    theta = jnp.arccos(cos_t)
    davg = 0.5 * (d[:, :, :, None] + d[:, :, None, :])
    fz = (1.0 + jnp.cos(theta[..., None] - ShfZ)) ** Zeta                # (...,8)
    fa = jnp.exp(-EtaA * (davg[..., None] - ShfA) ** 2)                  # (...,4)
    fcc = fc_a[:, :, :, None] * fc_a[:, :, None, :]
    tri_mask = (pair_mask[:, :, :, None] * pair_mask[:, :, None, :]
                * (~eye)[None, None, :, :].astype(jnp.float32))          # j!=k
    term = (2.0 ** (1.0 - Zeta)) * fz[..., :, None] * fa[..., None, :] \
        * (fcc * tri_mask)[..., None, None]                              # (B,A,A,A,8,4)

    pairs = [(0, 0), (0, 1), (0, 2), (0, 3), (1, 1), (1, 2), (1, 3),
             (2, 2), (2, 3), (3, 3)]
    pair_oh = []
    for sa, sb in pairs:
        p = oh[:, :, None, sa] * oh[:, None, :, sb]
        if sa != sb:
            p = p + oh[:, :, None, sb] * oh[:, None, :, sa]
        pair_oh.append(p)
    pair_oh = jnp.stack(pair_oh, axis=-1)                                # (B,A,A,10)

    g_ang = 0.5 * jnp.einsum("bijkza,bjkp->bipza", term, pair_oh)        # (B,A,10,8,4)
    g_ang = g_ang.reshape(B, A, 10 * 8 * 4)

    return jnp.concatenate([g_rad, g_ang], axis=-1)                      # (B,A,384)


def init_params(key):
    """Deterministic synthetic weights for the 4 atomic nets, zero-padded to the
    max hidden dims (padding is exact: pad biases are 0, CELU(0)=0, pad weight
    rows are 0)."""
    w1s, b1s, w2s, b2s, w3s, b3s, w4s, b4s = ([] for _ in range(8))
    for s, (h1, h2, h3) in enumerate(SPECIES_DIMS):
        ks = jax.random.split(jax.random.fold_in(key, s), 8)

        def kaiming(k, fan_in, shape):
            # kaiming_normal_(a=1.0): std = sqrt(2/(1+a^2)) / sqrt(fan_in)
            return jax.random.normal(k, shape, jnp.float32) * (1.0 / fan_in) ** 0.5

        w1 = kaiming(ks[0], AEV_DIM, (AEV_DIM, h1))
        b1 = jax.random.normal(ks[1], (h1,), jnp.float32) * 0.1
        w2 = kaiming(ks[2], h1, (h1, h2))
        b2 = jax.random.normal(ks[3], (h2,), jnp.float32) * 0.1
        w3 = kaiming(ks[4], h2, (h2, h3))
        b3 = jax.random.normal(ks[5], (h3,), jnp.float32) * 0.1
        w4 = kaiming(ks[6], h3, (h3, 1))
        b4 = jax.random.normal(ks[7], (1,), jnp.float32) * 0.1

        w1s.append(jnp.pad(w1, ((0, 0), (0, H1MAX - h1))))
        b1s.append(jnp.pad(b1, (0, H1MAX - h1))[None, :])
        w2s.append(jnp.pad(w2, ((0, H1MAX - h1), (0, H2MAX - h2))))
        b2s.append(jnp.pad(b2, (0, H2MAX - h2))[None, :])
        w3s.append(jnp.pad(w3, ((0, H2MAX - h2), (0, H3MAX - h3))))
        b3s.append(jnp.pad(b3, (0, H3MAX - h3))[None, :])
        w4s.append(jnp.pad(w4, ((0, H3MAX - h3), (0, 0))))
        b4s.append(b4[None, :])
    return dict(w1=jnp.stack(w1s), b1=jnp.stack(b1s),
                w2=jnp.stack(w2s), b2=jnp.stack(b2s),
                w3=jnp.stack(w3s), b3=jnp.stack(b3s),
                w4=jnp.stack(w4s), b4=jnp.stack(b4s))


# ----------------------------- Pallas kernel ------------------------------ #
def _make_ani_kernel(epilogue_dtype):
    def kernel(tile_sp_ref, aev_ref,
               w1_ref, b1_ref, w2_ref, b2_ref, w3_ref, b3_ref, w4_ref,
               out_ref):
        """One grid step = one tile of T atoms, all of ONE species (feature-major:
        features on sublanes, atoms on lanes).

          tile_sp_ref: (max_tiles,) i32 SMEM   (consumed only by the index_maps)
          aev_ref : (AEV_DIM, T)        bf16
          w1_ref  : (1, H1MAX, AEV_DIM) bf16    b1_ref: (1, H1MAX, 1) f32
          w2_ref  : (1, H2MAX, H1MAX)   bf16    b2_ref: (1, H2MAX, 1) f32
          w3_ref  : (1, H3MAX, H2MAX)   bf16    b3_ref: (1, H3MAX, 1) f32
          w4_ref  : (1, H3MAX, 1)       f32
          out_ref : (1, T)              f32   per-atom network output (no b4;
                                              b4 cancels in pred - vacuum)
        """
        del tile_sp_ref  # only used by the BlockSpec index_maps
        x = aev_ref[...]                                        # (384, T) bf16
        h = _celu((jnp.dot(w1_ref[0], x,
                           preferred_element_type=jnp.float32)
                   + b1_ref[0]).astype(epilogue_dtype))          # (160, T)
        h = _celu((jnp.dot(w2_ref[0], h.astype(jnp.bfloat16),
                           preferred_element_type=jnp.float32)
                   + b2_ref[0]).astype(epilogue_dtype))          # (128, T)
        h = _celu((jnp.dot(w3_ref[0], h.astype(jnp.bfloat16),
                           preferred_element_type=jnp.float32)
                   + b3_ref[0]).astype(epilogue_dtype))          # (96, T)
        # final (H3 -> 1) layer: VPU broadcast-mul + cross-sublane reduce
        # (avoids an N=1 MXU matmul); lane-dense (1, T) store.
        out_ref[...] = jnp.sum(w4_ref[0] * h.astype(jnp.float32),
                               axis=0, keepdims=True)
    return kernel


def _round_up(x, m):
    return ((x + m - 1) // m) * m


def _pick_epilogue_dtype():
    """bf16 CELU epilogue on v6e/v7x (bf16 VPU/EUP); f32 on v5e and older."""
    try:
        kind = jax.devices()[0].device_kind.lower()
    except Exception:
        return jnp.float32
    if any(tag in kind for tag in ("v6", "v7", "tpu7", "trillium")):
        return jnp.bfloat16
    return jnp.float32


def ani_ae_forward(species, coords, params, *, tile_atoms=1024):
    """Returns energies = pred(aev) - pred(zero_aev), shape (B,)."""
    aev = compute_aev(species, coords)            # (B, A, 384) JAX featurizer glue
    B, A = species.shape
    N = B * A

    sp_flat = species.reshape(N).astype(jnp.int32)
    valid = sp_flat >= 0
    sp = jnp.where(valid, sp_flat, 0)             # map padding atoms -> species 0

    # Append one zero-AEV "virtual atom" per species; its kernel output is the
    # vacuum baseline, evaluated through the exact same numeric path as real
    # atoms (the bf16 forward offset cancels exactly in pred - vacuum).
    NE = N + NUM_SPECIES
    sp_ext = jnp.concatenate([sp, jnp.arange(NUM_SPECIES, dtype=jnp.int32)])
    aev_rows = jnp.concatenate(
        [aev.reshape(N, AEV_DIM), jnp.zeros((NUM_SPECIES, AEV_DIM), aev.dtype)],
        axis=0)                                                          # (NE, 384)

    # Tile size: big tiles amortize the ~0.35us/step overhead; clamp for tiny N.
    T = min(tile_atoms, max(128, _round_up(NE, 128)))
    assert T % 128 == 0

    # ---- species grouping: sort by species, pad each group to a tile boundary
    onehot_sp = sp_ext[:, None] == jnp.arange(NUM_SPECIES)[None, :]
    counts = jnp.sum(onehot_sp, axis=0).astype(jnp.int32)                # (4,)
    tiles_per = (counts + T - 1) // T                                    # (4,)
    grp_tile_start = jnp.concatenate(
        [jnp.zeros((1,), jnp.int32), jnp.cumsum(tiles_per)[:-1]])
    grp_slot_start = grp_tile_start * T
    grp_sort_start = jnp.concatenate(
        [jnp.zeros((1,), jnp.int32), jnp.cumsum(counts)[:-1]])

    order = jnp.argsort(sp_ext)                   # atom indices grouped by species
    sp_sorted = sp_ext[order]
    rank_in_group = jnp.arange(NE, dtype=jnp.int32) - grp_sort_start[sp_sorted]
    slot_sorted = grp_slot_start[sp_sorted] + rank_in_group
    slot = jnp.zeros((NE,), jnp.int32).at[order].set(slot_sorted)        # per atom

    # Static worst-case tile count: floor(NE/T) full tiles + <=1 partial / species.
    max_tiles = (NE + T - 1) // T + NUM_SPECIES
    C = max_tiles * T

    # Per-tile species id (unused trailing tiles default to species 0; their
    # output slots are never read back).
    tile_ids = jnp.arange(max_tiles, dtype=jnp.int32)
    tile_sp = jnp.zeros((max_tiles,), jnp.int32)
    for s in range(NUM_SPECIES):
        in_s = (tile_ids >= grp_tile_start[s]) & (
            tile_ids < grp_tile_start[s] + tiles_per[s])
        tile_sp = jnp.where(in_s, s, tile_sp)

    # Scatter AEVs into grouped slots (pad slots stay zero); go feature-major.
    aev_slots = jnp.zeros((C, AEV_DIM), aev.dtype).at[slot].set(aev_rows)
    aev_t = aev_slots.T.astype(jnp.bfloat16)                             # (384, C)

    # Per-species weights, transposed for the feature-major layout.
    w1t = jnp.transpose(params["w1"], (0, 2, 1)).astype(jnp.bfloat16)    # (4,160,384)
    b1t = jnp.transpose(params["b1"], (0, 2, 1))                         # (4,160,1)
    w2t = jnp.transpose(params["w2"], (0, 2, 1)).astype(jnp.bfloat16)    # (4,128,160)
    b2t = jnp.transpose(params["b2"], (0, 2, 1))                         # (4,128,1)
    w3t = jnp.transpose(params["w3"], (0, 2, 1)).astype(jnp.bfloat16)    # (4,96,128)
    b3t = jnp.transpose(params["b3"], (0, 2, 1))                         # (4,96,1)
    w4t = params["w4"]                                                   # (4,96,1) f32

    kernel = _make_ani_kernel(_pick_epilogue_dtype())

    per_slot = pl.pallas_call(
        kernel,
        out_shape=jax.ShapeDtypeStruct((1, C), jnp.float32),
        grid_spec=pltpu.PrefetchScalarGridSpec(
            num_scalar_prefetch=1,                   # tile_sp -> SMEM
            grid=(max_tiles,),
            in_specs=[
                pl.BlockSpec((AEV_DIM, T), lambda t, tsp: (0, t)),
                # data-dependent weight selection: only the active species' net
                pl.BlockSpec((1, H1MAX, AEV_DIM), lambda t, tsp: (tsp[t], 0, 0)),
                pl.BlockSpec((1, H1MAX, 1), lambda t, tsp: (tsp[t], 0, 0)),
                pl.BlockSpec((1, H2MAX, H1MAX), lambda t, tsp: (tsp[t], 0, 0)),
                pl.BlockSpec((1, H2MAX, 1), lambda t, tsp: (tsp[t], 0, 0)),
                pl.BlockSpec((1, H3MAX, H2MAX), lambda t, tsp: (tsp[t], 0, 0)),
                pl.BlockSpec((1, H3MAX, 1), lambda t, tsp: (tsp[t], 0, 0)),
                pl.BlockSpec((1, H3MAX, 1), lambda t, tsp: (tsp[t], 0, 0)),
            ],
            out_specs=pl.BlockSpec((1, T), lambda t, tsp: (0, t)),
        ),
        compiler_params=pltpu.CompilerParams(
            dimension_semantics=("parallel",)),      # shards tiles across TCs (v7x)
    )(tile_sp, aev_t, w1t, b1t, w2t, b2t, w3t, b3t, w4t)

    # Gather back to original atom order; subtract the in-kernel vacuum baseline.
    per_slot = per_slot[0]                                               # (C,)
    baseline = per_slot[slot[N:]]                                        # (4,)
    e_atom = per_slot[slot[:N]] - baseline[sp]
    e_atom = jnp.where(valid, e_atom, 0.0)
    return jnp.sum(e_atom.reshape(B, A), axis=-1)                        # (B,)


# ------------------------------ JAX reference ------------------------------ #
def reference_forward(species, coords, params):
    aev = compute_aev(species, coords)
    mask = species_onehot(species)

    def per_species(x):                           # (B,A,384) -> (B,A,4)
        outs = []
        for s in range(NUM_SPECIES):
            h = _celu(x @ params["w1"][s] + params["b1"][s][0])
            h = _celu(h @ params["w2"][s] + params["b2"][s][0])
            h = _celu(h @ params["w3"][s] + params["b3"][s][0])
            y = h @ params["w4"][s] + params["b4"][s][0]
            outs.append(y[..., 0])
        return jnp.stack(outs, axis=-1)

    e_atom = jnp.sum(mask * per_species(aev), axis=-1)                   # (B,A)
    e_vac = jnp.sum(mask * per_species(jnp.zeros_like(aev)), axis=-1)    # (B,A)
    return jnp.sum(e_atom - e_vac, axis=-1)                              # (B,)


if __name__ == "__main__":
    key = jax.random.PRNGKey(0)
    k_sp, k_xy, k_pm = jax.random.split(key, 3)

    B, A = 2, 8                                   # 2 molecules, 8 atom slots each
    species = jax.random.randint(k_sp, (B, A), 0, NUM_SPECIES)
    species = species.at[1, A - 1].set(-1)        # one padded atom slot
    coords = jax.random.normal(k_xy, (B, A, 3), jnp.float32) * 2.0

    params = init_params(k_pm)

    energies = jax.jit(ani_ae_forward)(species, coords, params)
    energies = jax.block_until_ready(energies)

    ref = reference_forward(species, coords, params)
    assert energies.shape == (B,)
    assert bool(jnp.all(jnp.isfinite(energies)))
    assert bool(jnp.allclose(energies, ref, rtol=2e-2, atol=2e-2)), (energies, ref)

    print("KERNEL_OK")
</pallas_src>

<mosaic_0001>
module attributes {stable_mosaic.version = 11 : i64} {
  func.func @kernel(%arg0: i32, %arg1: memref<5xi32, #tpu.memory_space<smem>>, %arg2: memref<384x128xbf16, #tpu.memory_space<vmem>>, %arg3: memref<1x160x384xbf16, #tpu.memory_space<vmem>>, %arg4: memref<1x160x1xf32, #tpu.memory_space<vmem>>, %arg5: memref<1x128x160xbf16, #tpu.memory_space<vmem>>, %arg6: memref<1x128x1xf32, #tpu.memory_space<vmem>>, %arg7: memref<1x96x128xbf16, #tpu.memory_space<vmem>>, %arg8: memref<1x96x1xf32, #tpu.memory_space<vmem>>, %arg9: memref<1x96x1xf32, #tpu.memory_space<vmem>>, %arg10: memref<1x128xf32, #tpu.memory_space<vmem>>) attributes {dimension_semantics = [#tpu.dimension_semantics<parallel>], iteration_bounds = array<i64: 5>, scalar_prefetch = 1 : i64, scratch_operands = 0 : i64, tpu.core_type = #tpu.core_type<tc>, window_params = [{transform_indices = @transform_0, window_bounds = array<i64: 384, 128>}, {transform_indices = @transform_1, window_bounds = array<i64: 1, 160, 384>}, {transform_indices = @transform_2, window_bounds = array<i64: 1, 160, 1>}, {transform_indices = @transform_3, window_bounds = array<i64: 1, 128, 160>}, {transform_indices = @transform_4, window_bounds = array<i64: 1, 128, 1>}, {transform_indices = @transform_5, window_bounds = array<i64: 1, 96, 128>}, {transform_indices = @transform_6, window_bounds = array<i64: 1, 96, 1>}, {transform_indices = @transform_7, window_bounds = array<i64: 1, 96, 1>}, {transform_indices = @transform_8, window_bounds = array<i64: 1, 128>}]} {
    %c0 = arith.constant 0 : index
    %c0_0 = arith.constant 0 : index
    %0 = vector.load %arg2[%c0, %c0_0] : memref<384x128xbf16, #tpu.memory_space<vmem>>, vector<384x128xbf16>
    %c0_1 = arith.constant 0 : index
    %c0_2 = arith.constant 0 : index
    %c0_3 = arith.constant 0 : index
    %1 = vector.load %arg3[%c0_1, %c0_2, %c0_3] : memref<1x160x384xbf16, #tpu.memory_space<vmem>>, vector<1x160x384xbf16>
    %2 = vector.shape_cast %1 : vector<1x160x384xbf16> to vector<160x384xbf16>
    %cst = arith.constant dense<0.000000e+00> : vector<160x128xf32>
    %3 = tpu.matmul %2, %0, %cst {dimension_numbers = #tpu.dot_dimension_numbers<[1], [0], [0], [1], [0, 0, 1, 1], [], []>} : vector<160x384xbf16>, vector<384x128xbf16>, vector<160x128xf32> -> vector<160x128xf32>
    %c0_4 = arith.constant 0 : index
    %c0_5 = arith.constant 0 : index
    %c0_6 = arith.constant 0 : index
    %4 = vector.load %arg4[%c0_4, %c0_5, %c0_6] : memref<1x160x1xf32, #tpu.memory_space<vmem>>, vector<1x160x1xf32>
    %5 = vector.shape_cast %4 : vector<1x160x1xf32> to vector<160x1xf32>
    %6 = vector.broadcast %5 : vector<160x1xf32> to vector<160x128xf32>
    %7 = arith.addf %3, %6 : vector<160x128xf32>
    %cst_7 = arith.constant 0.000000e+00 : f32
    %8 = vector.broadcast %cst_7 : f32 to vector<160x128xf32>
    %9 = arith.maximumf %7, %8 : vector<160x128xf32>
    %cst_8 = arith.constant 0.000000e+00 : f32
    %10 = vector.broadcast %cst_8 : f32 to vector<160x128xf32>
    %11 = arith.minimumf %7, %10 : vector<160x128xf32>
    %cst_9 = arith.constant 1.000000e+01 : f32
    %12 = vector.broadcast %cst_9 : f32 to vector<160x128xf32>
    %13 = arith.mulf %11, %12 : vector<160x128xf32>
    %14 = math.exp %13 : vector<160x128xf32>
    %cst_10 = arith.constant 1.000000e+00 : f32
    %15 = vector.broadcast %cst_10 : f32 to vector<160x128xf32>
    %16 = arith.subf %14, %15 : vector<160x128xf32>
    %cst_11 = arith.constant 1.000000e-01 : f32
    %17 = vector.broadcast %cst_11 : f32 to vector<160x128xf32>
    %18 = arith.mulf %17, %16 : vector<160x128xf32>
    %19 = arith.addf %9, %18 : vector<160x128xf32>
    %c0_12 = arith.constant 0 : index
    %c0_13 = arith.constant 0 : index
    %c0_14 = arith.constant 0 : index
    %20 = vector.load %arg5[%c0_12, %c0_13, %c0_14] : memref<1x128x160xbf16, #tpu.memory_space<vmem>>, vector<1x128x160xbf16>
    %21 = vector.shape_cast %20 : vector<1x128x160xbf16> to vector<128x160xbf16>
    %22 = arith.truncf %19 : vector<160x128xf32> to vector<160x128xbf16>
    %cst_15 = arith.constant dense<0.000000e+00> : vector<128x128xf32>
    %23 = tpu.matmul %21, %22, %cst_15 {dimension_numbers = #tpu.dot_dimension_numbers<[1], [0], [0], [1], [0, 0, 1, 1], [], []>} : vector<128x160xbf16>, vector<160x128xbf16>, vector<128x128xf32> -> vector<128x128xf32>
    %c0_16 = arith.constant 0 : index
    %c0_17 = arith.constant 0 : index
    %c0_18 = arith.constant 0 : index
    %24 = vector.load %arg6[%c0_16, %c0_17, %c0_18] : memref<1x128x1xf32, #tpu.memory_space<vmem>>, vector<1x128x1xf32>
    %25 = vector.shape_cast %24 : vector<1x128x1xf32> to vector<128x1xf32>
    %26 = vector.broadcast %25 : vector<128x1xf32> to vector<128x128xf32>
    %27 = arith.addf %23, %26 : vector<128x128xf32>
    %cst_19 = arith.constant 0.000000e+00 : f32
    %28 = vector.broadcast %cst_19 : f32 to vector<128x128xf32>
    %29 = arith.maximumf %27, %28 : vector<128x128xf32>
    %cst_20 = arith.constant 0.000000e+00 : f32
    %30 = vector.broadcast %cst_20 : f32 to vector<128x128xf32>
    %31 = arith.minimumf %27, %30 : vector<128x128xf32>
    %cst_21 = arith.constant 1.000000e+01 : f32
    %32 = vector.broadcast %cst_21 : f32 to vector<128x128xf32>
    %33 = arith.mulf %31, %32 : vector<128x128xf32>
    %34 = math.exp %33 : vector<128x128xf32>
    %cst_22 = arith.constant 1.000000e+00 : f32
    %35 = vector.broadcast %cst_22 : f32 to vector<128x128xf32>
    %36 = arith.subf %34, %35 : vector<128x128xf32>
    %cst_23 = arith.constant 1.000000e-01 : f32
    %37 = vector.broadcast %cst_23 : f32 to vector<128x128xf32>
    %38 = arith.mulf %37, %36 : vector<128x128xf32>
    %39 = arith.addf %29, %38 : vector<128x128xf32>
    %c0_24 = arith.constant 0 : index
    %c0_25 = arith.constant 0 : index
    %c0_26 = arith.constant 0 : index
    %40 = vector.load %arg7[%c0_24, %c0_25, %c0_26] : memref<1x96x128xbf16, #tpu.memory_space<vmem>>, vector<1x96x128xbf16>
    %41 = vector.shape_cast %40 : vector<1x96x128xbf16> to vector<96x128xbf16>
    %42 = arith.truncf %39 : vector<128x128xf32> to vector<128x128xbf16>
    %cst_27 = arith.constant dense<0.000000e+00> : vector<96x128xf32>
    %43 = tpu.matmul %41, %42, %cst_27 {dimension_numbers = #tpu.dot_dimension_numbers<[1], [0], [0], [1], [0, 0, 1, 1], [], []>} : vector<96x128xbf16>, vector<128x128xbf16>, vector<96x128xf32> -> vector<96x128xf32>
    %c0_28 = arith.constant 0 : index
    %c0_29 = arith.constant 0 : index
    %c0_30 = arith.constant 0 : index
    %44 = vector.load %arg8[%c0_28, %c0_29, %c0_30] : memref<1x96x1xf32, #tpu.memory_space<vmem>>, vector<1x96x1xf32>
    %45 = vector.shape_cast %44 : vector<1x96x1xf32> to vector<96x1xf32>
    %46 = vector.broadcast %45 : vector<96x1xf32> to vector<96x128xf32>
    %47 = arith.addf %43, %46 : vector<96x128xf32>
    %cst_31 = arith.constant 0.000000e+00 : f32
    %48 = vector.broadcast %cst_31 : f32 to vector<96x128xf32>
    %49 = arith.maximumf %47, %48 : vector<96x128xf32>
    %cst_32 = arith.constant 0.000000e+00 : f32
    %50 = vector.broadcast %cst_32 : f32 to vector<96x128xf32>
    %51 = arith.minimumf %47, %50 : vector<96x128xf32>
    %cst_33 = arith.constant 1.000000e+01 : f32
    %52 = vector.broadcast %cst_33 : f32 to vector<96x128xf32>
    %53 = arith.mulf %51, %52 : vector<96x128xf32>
    %54 = math.exp %53 : vector<96x128xf32>
    %cst_34 = arith.constant 1.000000e+00 : f32
    %55 = vector.broadcast %cst_34 : f32 to vector<96x128xf32>
    %56 = arith.subf %54, %55 : vector<96x128xf32>
    %cst_35 = arith.constant 1.000000e-01 : f32
    %57 = vector.broadcast %cst_35 : f32 to vector<96x128xf32>
    %58 = arith.mulf %57, %56 : vector<96x128xf32>
    %59 = arith.addf %49, %58 : vector<96x128xf32>
    %c0_36 = arith.constant 0 : index
    %c0_37 = arith.constant 0 : index
    %c0_38 = arith.constant 0 : index
    %60 = vector.load %arg9[%c0_36, %c0_37, %c0_38] : memref<1x96x1xf32, #tpu.memory_space<vmem>>, vector<1x96x1xf32>
    %61 = vector.shape_cast %60 : vector<1x96x1xf32> to vector<96x1xf32>
    %62 = vector.broadcast %61 : vector<96x1xf32> to vector<96x128xf32>
    %63 = arith.mulf %62, %59 : vector<96x128xf32>
    %cst_39 = arith.constant dense<0.000000e+00> : vector<128xf32>
    %64 = vector.multi_reduction <add>, %63, %cst_39 [0] : vector<96x128xf32> to vector<128xf32>
    %65 = vector.shape_cast %64 : vector<128xf32> to vector<1x128xf32>
    %c0_40 = arith.constant 0 : index
    %c0_41 = arith.constant 0 : index
    %66 = vector.load %arg10[%c0_40, %c0_41] : memref<1x128xf32, #tpu.memory_space<vmem>>, vector<1x128xf32>
    tpu.vector_store %arg10[%c0_40, %c0_41], %65 {strides = array<i32>} : memref<1x128xf32, #tpu.memory_space<vmem>>, vector<1x128xf32>,
    return
  }
  func.func @transform_0(%arg0: i32, %arg1: memref<5xi32, #tpu.memory_space<smem>>) -> (i32, i32) {
    %c0_i32 = arith.constant 0 : i32
    %c0_i32_0 = arith.constant 0 : i32
    return %c0_i32, %arg0 : i32, i32
  }
  func.func @transform_1(%arg0: i32, %arg1: memref<5xi32, #tpu.memory_space<smem>>) -> (i32, i32, i32) {
    %0 = arith.index_cast %arg0 : i32 to index
    %1 = memref.load %arg1[%0] : memref<5xi32, #tpu.memory_space<smem>>
    %c0_i32 = arith.constant 0 : i32
    %c0_i32_0 = arith.constant 0 : i32
    %c0_i32_1 = arith.constant 0 : i32
    return %1, %c0_i32, %c0_i32_0 : i32, i32, i32
  }
  func.func @transform_2(%arg0: i32, %arg1: memref<5xi32, #tpu.memory_space<smem>>) -> (i32, i32, i32) {
    %0 = arith.index_cast %arg0 : i32 to index
    %1 = memref.load %arg1[%0] : memref<5xi32, #tpu.memory_space<smem>>
    %c0_i32 = arith.constant 0 : i32
    %c0_i32_0 = arith.constant 0 : i32
    %c0_i32_1 = arith.constant 0 : i32
    return %1, %c0_i32, %c0_i32_0 : i32, i32, i32
  }
  func.func @transform_3(%arg0: i32, %arg1: memref<5xi32, #tpu.memory_space<smem>>) -> (i32, i32, i32) {
    %0 = arith.index_cast %arg0 : i32 to index
    %1 = memref.load %arg1[%0] : memref<5xi32, #tpu.memory_space<smem>>
    %c0_i32 = arith.constant 0 : i32
    %c0_i32_0 = arith.constant 0 : i32
    %c0_i32_1 = arith.constant 0 : i32
    return %1, %c0_i32, %c0_i32_0 : i32, i32, i32
  }
  func.func @transform_4(%arg0: i32, %arg1: memref<5xi32, #tpu.memory_space<smem>>) -> (i32, i32, i32) {
    %0 = arith.index_cast %arg0 : i32 to index
    %1 = memref.load %arg1[%0] : memref<5xi32, #tpu.memory_space<smem>>
    %c0_i32 = arith.constant 0 : i32
    %c0_i32_0 = arith.constant 0 : i32
    %c0_i32_1 = arith.constant 0 : i32
    return %1, %c0_i32, %c0_i32_0 : i32, i32, i32
  }
  func.func @transform_5(%arg0: i32, %arg1: memref<5xi32, #tpu.memory_space<smem>>) -> (i32, i32, i32) {
    %0 = arith.index_cast %arg0 : i32 to index
    %1 = memref.load %arg1[%0] : memref<5xi32, #tpu.memory_space<smem>>
    %c0_i32 = arith.constant 0 : i32
    %c0_i32_0 = arith.constant 0 : i32
    %c0_i32_1 = arith.constant 0 : i32
    return %1, %c0_i32, %c0_i32_0 : i32, i32, i32
  }
  func.func @transform_6(%arg0: i32, %arg1: memref<5xi32, #tpu.memory_space<smem>>) -> (i32, i32, i32) {
    %0 = arith.index_cast %arg0 : i32 to index
    %1 = memref.load %arg1[%0] : memref<5xi32, #tpu.memory_space<smem>>
    %c0_i32 = arith.constant 0 : i32
    %c0_i32_0 = arith.constant 0 : i32
    %c0_i32_1 = arith.constant 0 : i32
    return %1, %c0_i32, %c0_i32_0 : i32, i32, i32
  }
  func.func @transform_7(%arg0: i32, %arg1: memref<5xi32, #tpu.memory_space<smem>>) -> (i32, i32, i32) {
    %0 = arith.index_cast %arg0 : i32 to index
    %1 = memref.load %arg1[%0] : memref<5xi32, #tpu.memory_space<smem>>
    %c0_i32 = arith.constant 0 : i32
    %c0_i32_0 = arith.constant 0 : i32
    %c0_i32_1 = arith.constant 0 : i32
    return %1, %c0_i32, %c0_i32_0 : i32, i32, i32
  }
  func.func @transform_8(%arg0: i32, %arg1: memref<5xi32, #tpu.memory_space<smem>>) -> (i32, i32) {
    %c0_i32 = arith.constant 0 : i32
    %c0_i32_0 = arith.constant 0 : i32
    return %c0_i32, %arg0 : i32, i32
  }
}

</mosaic_0001>

<bundles_post_ra>
// kernel: sub.22
= control target key start
LH: loop header
LB: loop body
LE: loop exit
PB: predicated region body
PF: predicated region fallthrough
CT: control target
= control target key end

     0   :  { %s34_s0 = inlined_call_operand.vmem [shape: f32[16], index: 0, kind: input, shape index: {}]   ;;  %s35_s1 = inlined_call_operand.vmem [shape: f32[16], index: 1, kind: input, shape index: {}]   ;;  %s36_s2 = inlined_call_operand.vmem [shape: f32[16], index: 2, kind: output, shape index: {}]  }
   0x1   :  { %v3_v0 = vld [vmem:[%s34_s0] sm:$0x1] }
   0x2   :  { %v4_v1 = vld [vmem:[%s35_s1] sm:$0x1] }
   0x3   :  { %v7_v2 = vsub.f32 %v3_v0, %v4_v1 }
   0x5   :  { %9 = vst [vmem:[%s36_s2] sm:$0x1] %v7_v2 }

// kernel: ani_ae_forward.1
= control target key start
LH: loop header
LB: loop body
LE: loop exit
PB: predicated region body
PF: predicated region fallthrough
CT: control target
= control target key end

     0   :  { %s3805_s0 = inlined_call_operand.vmem [shape: s32[5], index: 0, kind: input, shape index: {}]   ;;  %s3806_s1 = inlined_call_operand.vmem [shape: bf16[384,640], index: 1, kind: input, shape index: {}]   ;;  %s3807_s2 = inlined_call_operand.vmem [shape: bf16[4,160,384], index: 2, kind: input, shape index: {}]   ;;  %s3808_s3 = inlined_call_operand.vmem [shape: f32[4,160,1], index: 3, kind: input, shape index: {}]   ;;  %s3809_s4 = inlined_call_operand.vmem [shape: bf16[4,128,160], index: 4, kind: input, shape index: {}]   ;;  %s3810_s5 = inlined_call_operand.vmem [shape: f32[4,128,1], index: 5, kind: input, shape index: {}]   ;;  %s3811_s6 = inlined_call_operand.vmem [shape: bf16[4,96,128], index: 6, kind: input, shape index: {}]   ;;  %s3812_s7 = inlined_call_operand.vmem [shape: f32[4,96,1], index: 7, kind: input, shape index: {}]   ;;  %s3813_s8 = inlined_call_operand.vmem [shape: f32[4,96,1], index: 8, kind: input, shape index: {}]   ;;  %s3814_s9 = inlined_call_operand.vmem [shape: f32[1,640], index: 9, kind: output, shape index: {}]  }
   0x1   :  { %s14_s11 = sshll.u32 %s3805_s0, 4  ;;  %s15_s11 = int_to_ptr.vmem [resolvable:$true] %s14_s11 }
   0x2   :  { %s3162_s12 = scalar_lea.vmem %s15_s11, 16  ;;  %p3167_p1 = scmp.lt.s32.totalorder %s15_s11, %s15_s11 }
   0x3   :  { %p3163_p0 = scmp.ne.s32.totalorder %s15_s11, %s3162_s12  ;;  %p3168_p2 = scmp.lt.s32.totalorder %s3162_s12, %s3162_s12 }
   0x5   :  { %p3169_p3 = por %p3168_p2, %p3167_p1 }
   0x7   :  { %p3170_p4 = pnand %p3169_p3, %p3163_p0 }
   0x9   :  { %3173 = shalt.err (!%p3170_p4)  }
   0xa   :  { %s3200_s13 = smov [#allocation3]  }
   0xb   :  { %17 = dma.vmem_to_smem %s15_s11, 16, %s3200_s13, [#allocation2] }
   0xc   :  { %3186 = dma.done.wait [#allocation2], 16 }
   0xd   :  { %3187 = vsyncadd [#allocation2], 4294967280 }
   0xe   :  { %19 = sfence }
   0xf   :  { %s3255_s14 = smov 0   ;;  %s3257_s15 = smov 0  }
  0x10   :  { %s3259_s16 = smov 0  }
  0x11 LB: > { %s3271_s0 = sadd.s32 4294967295, %s3198_s16   ;;  %s3274_s17 = sadd.s32 1, %s3198_s16   ;;  %s3198_s16 = sphi %s3259_s16, %s3817_s16   ;;  %s3194_s15 = sphi %s3257_s15, %s3816_s15   ;;  %s3190_s14 = sphi %s3255_s14, %s3815_s14  }
  0x12   : > { %s29_s18 = ssub.s32 %s3198_s16, %s3274_s17  ;;  %s32_s19 = sadd.s32 1, %s3194_s15 }
  0x13   : > { %p30_p5 = scmp.eq.s32.totalorder %s29_s18, 0  ;;  %p39_p6 = scmp.ne.s32.totalorder %s3194_s15, %s3190_s14 }
  0x14   : > { %p40_p7 = scmp.eq.s32.totalorder %s3198_s16, 0  ;;  %p2617_p9 = scmp.ge.s32.totalorder %s3198_s16, 5 }
  0x15   : > { %s3283_s20 = scalar_select %p30_p5, %s3194_s15, %s32_s19  }
  0x16   : > { %p41_p8 = por %p40_p7, %p39_p6  ;;  %287 = sbr.rel (%p2617_p9) target bundleno = 65 (0x41), region = 16 }
  0x1d   : > { %290 = sbr.rel (!%p41_p8) target bundleno = 65 (0x41), region = 20  ;;  %s292_s21 = sand.u32 (%p41_p8), 1, %s3194_s15  }
  0x1e   : > { %s2618_s22 = sshll.u32 (%p41_p8), %s3198_s16, 2  ;;  %s2937_s23 = smul.u32 (%p41_p8), 192, %s292_s21 }
  0x1f   : > { %s3291_s26 = scalar_lea.vmem (%p41_p8), %s3806_s1, %s2618_s22 }
  0x20   : > { %v312_v0 = vld [vmem:[%s3291_s26] sm:$0xf] (%p41_p8)  ;;  %v314_v1 = vld [vmem:[%s3291_s26 + $0x14] sm:$0xf] (%p41_p8)  ;;  %v316_v2 = vld [vmem:[%s3291_s26 + $0x28] sm:$0xf] (%p41_p8) }
  0x21   : > { %v318_v3 = vld [vmem:[%s3291_s26 + $0x3c] sm:$0xf] (%p41_p8)  ;;  %v320_v4 = vld [vmem:[%s3291_s26 + $0x50] sm:$0xf] (%p41_p8)  ;;  %s3298_s27 = scalar_lea.vmem (%p41_p8), [#allocation4], %s2937_s23 }
  0x22   : > { %313 = vst [vmem:[%s3298_s27] sm:$0xf] (%p41_p8), %v312_v0  ;;  %315 = vst [vmem:[%s3298_s27 + $0x4] sm:$0xf] (%p41_p8), %v314_v1  ;;  %v322_v5 = vld [vmem:[%s3291_s26 + $0x64] sm:$0xf] (%p41_p8) }
  0x23   : > { %317 = vst [vmem:[%s3298_s27 + $0x8] sm:$0xf] (%p41_p8), %v316_v2  ;;  %319 = vst [vmem:[%s3298_s27 + $0xc] sm:$0xf] (%p41_p8), %v318_v3  ;;  %v324_v6 = vld [vmem:[%s3291_s26 + $0x78] sm:$0xf] (%p41_p8) }
  0x24   : > { %321 = vst [vmem:[%s3298_s27 + $0x10] sm:$0xf] %v320_v4  ;;  %v326_v7 = vld [vmem:[%s3291_s26 + $0x8c] sm:$0xf]  ;;  %323 = vst [vmem:[%s3298_s27 + $0x14] sm:$0xf] %v322_v5 }
  0x25   : > { %325 = vst [vmem:[%s3298_s27 + $0x18] sm:$0xf] %v324_v6  ;;  %327 = vst [vmem:[%s3298_s27 + $0x1c] sm:$0xf] %v326_v7  ;;  %v328_v8 = vld [vmem:[%s3291_s26 + $0xa0] sm:$0xf] }
  0x26   : > { %v330_v9 = vld [vmem:[%s3291_s26 + $0xb4] sm:$0xf]  ;;  %v332_v10 = vld [vmem:[%s3291_s26 + $0xc8] sm:$0xf]  ;;  %329 = vst [vmem:[%s3298_s27 + $0x20] sm:$0xf] %v328_v8 }
  0x27   : > { %331 = vst [vmem:[%s3298_s27 + $0x24] sm:$0xf] %v330_v9  ;;  %333 = vst [vmem:[%s3298_s27 + $0x28] sm:$0xf] %v332_v10  ;;  %v334_v11 = vld [vmem:[%s3291_s26 + $0xdc] sm:$0xf] }
  0x28   : > { %v336_v12 = vld [vmem:[%s3291_s26 + $0xf0] sm:$0xf]  ;;  %v338_v13 = vld [vmem:[%s3291_s26 + $0x104] sm:$0xf]  ;;  %335 = vst [vmem:[%s3298_s27 + $0x2c] sm:$0xf] %v334_v11 }
  0x29   : > { %337 = vst [vmem:[%s3298_s27 + $0x30] sm:$0xf] %v336_v12  ;;  %339 = vst [vmem:[%s3298_s27 + $0x34] sm:$0xf] %v338_v13  ;;  %v340_v14 = vld [vmem:[%s3291_s26 + $0x118] sm:$0xf] }
  0x2a   : > { %v342_v15 = vld [vmem:[%s3291_s26 + $0x12c] sm:$0xf]  ;;  %v344_v16 = vld [vmem:[%s3291_s26 + $0x140] sm:$0xf]  ;;  %341 = vst [vmem:[%s3298_s27 + $0x38] sm:$0xf] %v340_v14 }
  0x2b   : > { %343 = vst [vmem:[%s3298_s27 + $0x3c] sm:$0xf] %v342_v15  ;;  %345 = vst [vmem:[%s3298_s27 + $0x40] sm:$0xf] %v344_v16  ;;  %v346_v17 = vld [vmem:[%s3291_s26 + $0x154] sm:$0xf] }
  0x2c   : > { %v348_v18 = vld [vmem:[%s3291_s26 + $0x168] sm:$0xf]  ;;  %v350_v19 = vld [vmem:[%s3291_s26 + $0x17c] sm:$0xf]  ;;  %347 = vst [vmem:[%s3298_s27 + $0x44] sm:$0xf] %v346_v17 }
  0x2d   : > { %349 = vst [vmem:[%s3298_s27 + $0x48] sm:$0xf] %v348_v18  ;;  %351 = vst [vmem:[%s3298_s27 + $0x4c] sm:$0xf] %v350_v19  ;;  %v352_v20 = vld [vmem:[%s3291_s26 + $0x190] sm:$0xf] }
  0x2e   : > { %v354_v21 = vld [vmem:[%s3291_s26 + $0x1a4] sm:$0xf]  ;;  %v356_v22 = vld [vmem:[%s3291_s26 + $0x1b8] sm:$0xf]  ;;  %353 = vst [vmem:[%s3298_s27 + $0x50] sm:$0xf] %v352_v20 }
  0x2f   : > { %355 = vst [vmem:[%s3298_s27 + $0x54] sm:$0xf] %v354_v21  ;;  %357 = vst [vmem:[%s3298_s27 + $0x58] sm:$0xf] %v356_v22  ;;  %v358_v23 = vld [vmem:[%s3291_s26 + $0x1cc] sm:$0xf] }
  0x30   : > { %v360_v24 = vld [vmem:[%s3291_s26 + $0x1e0] sm:$0xf]  ;;  %v362_v25 = vld [vmem:[%s3291_s26 + $0x1f4] sm:$0xf]  ;;  %359 = vst [vmem:[%s3298_s27 + $0x5c] sm:$0xf] %v358_v23 }
  0x31   : > { %361 = vst [vmem:[%s3298_s27 + $0x60] sm:$0xf] %v360_v24  ;;  %363 = vst [vmem:[%s3298_s27 + $0x64] sm:$0xf] %v362_v25  ;;  %v364_v26 = vld [vmem:[%s3291_s26 + $0x208] sm:$0xf] }
  0x32   : > { %v366_v27 = vld [vmem:[%s3291_s26 + $0x21c] sm:$0xf]  ;;  %v368_v28 = vld [vmem:[%s3291_s26 + $0x230] sm:$0xf]  ;;  %365 = vst [vmem:[%s3298_s27 + $0x68] sm:$0xf] %v364_v26 }
  0x33   : > { %367 = vst [vmem:[%s3298_s27 + $0x6c] sm:$0xf] %v366_v27  ;;  %369 = vst [vmem:[%s3298_s27 + $0x70] sm:$0xf] %v368_v28  ;;  %v370_v29 = vld [vmem:[%s3291_s26 + $0x244] sm:$0xf] }
  0x34   : > { %v372_v30 = vld [vmem:[%s3291_s26 + $0x258] sm:$0xf]  ;;  %v374_v31 = vld [vmem:[%s3291_s26 + $0x26c] sm:$0xf]  ;;  %371 = vst [vmem:[%s3298_s27 + $0x74] sm:$0xf] %v370_v29 }
  0x35   : > { %373 = vst [vmem:[%s3298_s27 + $0x78] sm:$0xf] %v372_v30  ;;  %375 = vst [vmem:[%s3298_s27 + $0x7c] sm:$0xf] %v374_v31  ;;  %v376_v32 = vld [vmem:[%s3291_s26 + $0x280] sm:$0xf] }
  0x36   : > { %v378_v33 = vld [vmem:[%s3291_s26 + $0x294] sm:$0xf]  ;;  %v380_v34 = vld [vmem:[%s3291_s26 + $0x2a8] sm:$0xf]  ;;  %377 = vst [vmem:[%s3298_s27 + $0x80] sm:$0xf] %v376_v32 }
  0x37   : > { %379 = vst [vmem:[%s3298_s27 + $0x84] sm:$0xf] %v378_v33  ;;  %381 = vst [vmem:[%s3298_s27 + $0x88] sm:$0xf] %v380_v34  ;;  %v382_v35 = vld [vmem:[%s3291_s26 + $0x2bc] sm:$0xf] }
  0x38   : > { %v384_v36 = vld [vmem:[%s3291_s26 + $0x2d0] sm:$0xf]  ;;  %v386_v37 = vld [vmem:[%s3291_s26 + $0x2e4] sm:$0xf]  ;;  %383 = vst [vmem:[%s3298_s27 + $0x8c] sm:$0xf] %v382_v35 }
  0x39   : > { %385 = vst [vmem:[%s3298_s27 + $0x90] sm:$0xf] %v384_v36  ;;  %387 = vst [vmem:[%s3298_s27 + $0x94] sm:$0xf] %v386_v37  ;;  %v388_v38 = vld [vmem:[%s3291_s26 + $0x2f8] sm:$0xf] }
  0x3a   : > { %v390_v39 = vld [vmem:[%s3291_s26 + $0x30c] sm:$0xf]  ;;  %v392_v40 = vld [vmem:[%s3291_s26 + $0x320] sm:$0xf]  ;;  %389 = vst [vmem:[%s3298_s27 + $0x98] sm:$0xf] %v388_v38 }
  0x3b   : > { %391 = vst [vmem:[%s3298_s27 + $0x9c] sm:$0xf] %v390_v39  ;;  %393 = vst [vmem:[%s3298_s27 + $0xa0] sm:$0xf] %v392_v40  ;;  %v394_v41 = vld [vmem:[%s3291_s26 + $0x334] sm:$0xf] }
  0x3c   : > { %v396_v42 = vld [vmem:[%s3291_s26 + $0x348] sm:$0xf]  ;;  %v398_v43 = vld [vmem:[%s3291_s26 + $0x35c] sm:$0xf]  ;;  %395 = vst [vmem:[%s3298_s27 + $0xa4] sm:$0xf] %v394_v41 }
  0x3d   : > { %397 = vst [vmem:[%s3298_s27 + $0xa8] sm:$0xf] %v396_v42  ;;  %399 = vst [vmem:[%s3298_s27 + $0xac] sm:$0xf] %v398_v43  ;;  %v400_v44 = vld [vmem:[%s3291_s26 + $0x370] sm:$0xf] }
  0x3e   : > { %v402_v45 = vld [vmem:[%s3291_s26 + $0x384] sm:$0xf]  ;;  %v404_v46 = vld [vmem:[%s3291_s26 + $0x398] sm:$0xf]  ;;  %401 = vst [vmem:[%s3298_s27 + $0xb0] sm:$0xf] %v400_v44 }
  0x3f   : > { %403 = vst [vmem:[%s3298_s27 + $0xb4] sm:$0xf] %v402_v45  ;;  %405 = vst [vmem:[%s3298_s27 + $0xb8] sm:$0xf] %v404_v46  ;;  %v406_v47 = vld [vmem:[%s3291_s26 + $0x3ac] sm:$0xf] }
  0x40   : > { %407 = vst [vmem:[%s3298_s27 + $0xbc] sm:$0xf] %v406_v47 }
  0x41 PF: > { %p2619_p10 = scmp.ge.s32.totalorder %s3198_s16, 1  ;;  %p595_p11 = scmp.lt.s32.totalorder %s3198_s16, 6 }
  0x43   : > { %p596_p12 = pnand %p2619_p10, %p595_p11 }
  0x44   : > { %s602_s28 = sand.u32 (!%p596_p12), 1, %s3190_s14   ;;  %v3201_v48 = vmov (!%p596_p12), 0   ;;  %s675_s10 = sld [smem:[#allocation3 + %s3271_s0]] (!%p596_p12)  ;;  %vm1820_vm0 = vcmask (!%p596_p12), 261120  }
  0x45   : > { %599 = sbr.rel (%p596_p12) target bundleno = 1005 (0x3ed), region = 89  ;;  %2970 = vset.pattern.permute.xlu0 (!%p596_p12), %v3201_v48  ;;  %2971 = vset.pattern.permute.xlu1 (!%p596_p12), %v3201_v48  ;;  %s682_s11 = sld [smem:[#allocation3 + %s3271_s0]] (!%p596_p12) }
  0x46   : > { %s2938_s29 = smul.u32 (!%p596_p12), 192, %s602_s28  ;;  %s696_s23 = sld [smem:[#allocation3 + %s3271_s0]] (!%p596_p12) }
  0x47   : > { %s710_s28 = sld [smem:[#allocation3 + %s3271_s0]] (!%p596_p12)  ;;  %p724_p6 = scmp.lt.s32.totalorder (!%p596_p12), %s3271_s0, 4 }
  0x48   : > { %s3396_s30 = scalar_lea.vmem (!%p596_p12), [#allocation4], %s2938_s29  ;;  %s689_s19 = sld [smem:[#allocation3 + %s3271_s0]] (!%p596_p12) }
  0x49   : > { %v2972_v49 = vld [vmem:[%s3396_s30 + $0x40] sm:$0xff] (!%p596_p12)   ;;  %v2974_v51 = vld [vmem:[%s3396_s30 + $0x48] sm:$0xff] (!%p596_p12)   ;;  %v2977_v54 = vld [vmem:[%s3396_s30 + $0x50] sm:$0xff] (!%p596_p12)   ;;  %s703_s25 = sld [smem:[#allocation3 + %s3271_s0]] (!%p596_p12) }
  0x4a   : > { %v2973_v50 = vld [vmem:[%s3396_s30] sm:$0xff] (!%p596_p12)   ;;  %2765 = vmatprep.subr.bf16.mxu0 (!%p596_p12), %v2972_v49  ;;  %v2976_v53 = vld [vmem:[%s3396_s30 + $0x8] sm:$0xff] (!%p596_p12)   ;;  %v2979_v56 = vld [vmem:[%s3396_s30 + $0x10] sm:$0xff] (!%p596_p12)   ;;  %p676_p13 = scmp.lt.s32.totalorder (!%p596_p12), %s675_s10, 3 }
  0x4b   : > { %2766 = vmatpush3.bf16.msra.mxu0 (!%p596_p12), %v2973_v50  ;;  %v2975_v52 = vld [vmem:[%s3396_s30 + $0x80] sm:$0xff] (!%p596_p12)   ;;  %v2978_v55 = vld [vmem:[%s3396_s30 + $0x88] sm:$0xff] (!%p596_p12)   ;;  %v2980_v57 = vld [vmem:[%s3396_s30 + $0x58] sm:$0xff] (!%p596_p12)   ;;  %p683_p0 = scmp.lt.s32.totalorder (!%p596_p12), %s682_s11, 3 }
  0x4c   : > { %2767 = vmatprep.subr.bf16.mxu0 %v2974_v51  ;;  %2873 = vmatprep.subr.bf16.mxu1 %v2975_v52  ;;  %v2981_v58 = vld [vmem:[%s3396_s30 + $0x90] sm:$0xff]   ;;  %v2982_v59 = vld [vmem:[%s3396_s30 + $0x18] sm:$0xff]   ;;  %v2983_v60 = vld [vmem:[%s3396_s30 + $0x60] sm:$0xff]   ;;  %s3819_s10 = smov (!%p676_p13, %s675_s10), 3  ;;  %p697_p1 = scmp.lt.s32.totalorder %s696_s23, 3 }
  0x4d   : > { %2874 = vmatpush3.bf16.msra.mxu1 %v2975_v52  ;;  %v2984_v61 = vld [vmem:[%s3396_s30 + $0x98] sm:$0xff]   ;;  %v2985_v62 = vld [vmem:[%s3396_s30 + $0x20] sm:$0xff]   ;;  %v2986_v0 = vld [vmem:[%s3396_s30 + $0x68] sm:$0xff]   ;;  %s3821_s11 = smov (!%p683_p0, %s682_s11), 3  ;;  %s2939_s12 = smul.u32 240, %s3819_s10 }
  0x4e   : > { %2875 = vmatprep.subr.bf16.mxu1 %v2978_v55  ;;  %v2987_v63 = vld [vmem:[%s3396_s30 + $0xa0] sm:$0xff]   ;;  %v2988_v1 = vld [vmem:[%s3396_s30 + $0x28] sm:$0xff]   ;;  %v2989_v3 = vld [vmem:[%s3396_s30 + $0x70] sm:$0xff]   ;;  %s2940_s13 = smul.u32 160, %s3821_s11  ;;  %s3823_s23 = smov (!%p697_p1, %s696_s23), 3 }
  0x4f   : > { %2768 = vmatpush3.bf16.msra.mxu0 %v2976_v53  ;;  %v2990_v2 = vld [vmem:[%s3396_s30 + $0xa8] sm:$0xff]   ;;  %v2991_v4 = vld [vmem:[%s3396_s30 + $0x30] sm:$0xff]   ;;  %s3423_s18 = scalar_lea.vmem %s3807_s2, %s2939_s12  ;;  %v2992_v5 = vld [vmem:[%s3396_s30 + $0x78] sm:$0xff]   ;;  %s2764_s24 = sshll.u32 %s3823_s23, 7 }
  0x50   : > { %2769 = vmatprep.subr.bf16.mxu0 %v2977_v54  ;;  %v2993_v6 = vld [vmem:[%s3396_s30 + $0xb0] sm:$0xff]   ;;  %s3431_s22 = scalar_lea.vmem %s3808_s3, %s2940_s13  ;;  %v2994_v8 = vld [vmem:[%s3396_s30 + $0x38] sm:$0xff]   ;;  %v2995_v12 = vld [vmem:[%s3423_s18] ss:$12 sps:$4 sm:$0xff]   ;;  %s3478_s27 = scalar_lea.vmem %s3810_s5, %s2764_s24 }
  0x51   : > { %2876 = vmatpush3.bf16.msra.mxu1 %v2978_v55  ;;  %v2997_v7 = vld [vmem:[%s3423_s18 + $0x4] ss:$12 sps:$4 sm:$0xff]   ;;  %v2999_v9 = vld [vmem:[%s3423_s18 + $0x8] ss:$12 sps:$4 sm:$0xff]   ;;  %v2998_v10 = vld [vmem:[%s3396_s30 + $0xb8] sm:$0xff]   ;;  %p711_p2 = scmp.lt.s32.totalorder %s710_s28, 3 }
  0x52   : > { %2877 = vmatprep.subr.bf16.mxu1 %v2981_v58  ;;  %1272 = vmatprep.mubr.bf16.mxu0 %v2997_v7  ;;  %v816_v11 = vld [vmem:[%s3431_s22] sm:$0xff]  ;;  %v818_v13 = vld [vmem:[%s3431_s22 + $0x10] sm:$0xff]  ;;  %v817_v14 = vld [vmem:[%s3431_s22 + $0x8] sm:$0xff]  ;;  %s717_s12 = sld [smem:[#allocation3 + %s3271_s0]]  ;;  %p690_p4 = scmp.lt.s32.totalorder %s689_s19, 3 }
  0x53   : > { %2770 = vmatpush3.bf16.msra.mxu0 %v2979_v56  ;;  %2889 = vmatprep.mubr.bf16.mxu1 %v2999_v9  ;;  %v3001_v15 = vld [vmem:[%s3423_s18 + $0x1c] ss:$12 sps:$4 sm:$0xff]   ;;  %v3000_v17 = vld [vmem:[%s3423_s18 + $0x20] ss:$12 sps:$4 sm:$0xff]   ;;  %v3007_v19 = vld [vmem:[%s3423_s18 + $0x38] ss:$12 sps:$4 sm:$0xff]  }
  0x54   : > { %2771 = vmatprep.subr.bf16.mxu0 %v2980_v57  ;;  %838 = vperm.xlu0 %2970, %v816_v11   ;;  %v819_v16 = vld [vmem:[%s3431_s22 + $0x18] sm:$0xff]  ;;  %v820_v18 = vld [vmem:[%s3431_s22 + $0x20] sm:$0xff]  ;;  %v821_v20 = vld [vmem:[%s3431_s22 + $0x28] sm:$0xff]  ;;  %s3825_s28 = smov (!%p711_p2, %s710_s28), 3  ;;  %s3829_s19 = smov (!%p690_p4, %s689_s19), 3 }
  0x55   : > { %2878 = vmatpush3.bf16.msra.mxu1 %v2981_v58  ;;  %848 = vperm.xlu1 %2971, %v818_v13   ;;  %v3003_v21 = vld [vmem:[%s3423_s18 + $0x18] ss:$12 sps:$4 sm:$0xff]   ;;  %v822_v22 = vld [vmem:[%s3431_s22 + $0x30] sm:$0xff]  ;;  %v825_v28 = vld [vmem:[%s3431_s22 + $0x48] sm:$0xff]  ;;  %s2942_s29 = smul.u32 96, %s3825_s28  ;;  %s2763_s21 = sshll.u32 %s3829_s19, 7 }
  0x56   : > { %2879 = vmatprep.subr.bf16.mxu1 %v2984_v61  ;;  %v3004_v23 = vld [vmem:[%s3423_s18 + $0x34] ss:$12 sps:$4 sm:$0xff]   ;;  %v823_v24 = vld [vmem:[%s3431_s22 + $0x38] sm:$0xff]  ;;  %v829_v36 = vld [vmem:[%s3431_s22 + $0x68] sm:$0xff]  ;;  %s3533_s24 = scalar_lea.vmem %s3809_s4, %s2763_s21  ;;  %p704_p5 = scmp.lt.s32.totalorder %s703_s25, 3 }
  0x57   : > { %2772 = vmatpush3.bf16.msra.mxu0 %v2982_v59  ;;  %v3008_v25 = vld [vmem:[%s3423_s18 + $0x50] ss:$12 sps:$4 sm:$0xff]   ;;  %v824_v26 = vld [vmem:[%s3431_s22 + $0x40] sm:$0xff]  ;;  %v3015_v27 = vld [vmem:[%s3423_s18 + $0x68] ss:$12 sps:$4 sm:$0xff]   ;;  %s3509_s11 = scalar_lea.vmem %s3812_s7, %s2942_s29  ;;  %s3833_s0 = smov (!%p724_p6, %s3271_s0), 4 }
  0x58   : > { %2773 = vmatprep.subr.bf16.mxu0 %v2983_v60  ;;  %843 = vperm.xlu0 %2970, %v817_v14   ;;  %v3006_v29 = vld [vmem:[%s3423_s18 + $0x30] ss:$12 sps:$4 sm:$0xff]   ;;  %v3009_v31 = vld [vmem:[%s3423_s18 + $0x4c] ss:$12 sps:$4 sm:$0xff]   ;;  %v828_v34 = vld [vmem:[%s3431_s22 + $0x60] sm:$0xff]  ;;  %p718_p3 = scmp.lt.s32.totalorder %s717_s12, 3 }
  0x59   : > { %2880 = vmatpush3.bf16.msra.mxu1 %v2984_v61  ;;  %853 = vperm.xlu1 %2971, %v819_v16   ;;  %v826_v30 = vld [vmem:[%s3431_s22 + $0x50] sm:$0xff]  ;;  %v827_v32 = vld [vmem:[%s3431_s22 + $0x58] sm:$0xff]  ;;  %v3016_v33 = vld [vmem:[%s3423_s18 + $0x80] ss:$12 sps:$4 sm:$0xff]   ;;  %s3831_s25 = smov (!%p704_p5, %s703_s25), 3 }
  0x5a   : > { %2881 = vmatprep.subr.bf16.mxu1 %v2987_v63  ;;  %v3023_v35 = vld [vmem:[%s3423_s18 + $0x98] ss:$12 sps:$4 sm:$0xff]   ;;  %v3011_v37 = vld [vmem:[%s3423_s18 + $0x48] ss:$12 sps:$4 sm:$0xff]   ;;  %v3024_v41 = vld [vmem:[%s3423_s18 + $0xb0] ss:$12 sps:$4 sm:$0xff]  }
  0x5b   : > { %2774 = vmatpush3.bf16.msra.mxu0 %v2985_v62  ;;  %v830_v38 = vld [vmem:[%s3431_s22 + $0x70] sm:$0xff]  ;;  %v831_v40 = vld [vmem:[%s3431_s22 + $0x78] sm:$0xff]  ;;  %v832_v42 = vld [vmem:[%s3431_s22 + $0x80] sm:$0xff]  ;;  %s3827_s12 = smov (!%p718_p3, %s717_s12), 3  ;;  %s2941_s26 = smul.u32 48, %s3831_s25 }
  0x5c   : > { %2775 = vmatprep.subr.bf16.mxu0 %v2986_v0  ;;  %858 = vperm.xlu0 %2970, %v820_v18   ;;  %v3012_v39 = vld [vmem:[%s3423_s18 + $0x64] ss:$12 sps:$4 sm:$0xff]   ;;  %v3031_v43 = vld [vmem:[%s3423_s18 + $0xc8] ss:$12 sps:$4 sm:$0xff]   ;;  %v3014_v45 = vld [vmem:[%s3423_s18 + $0x60] ss:$12 sps:$4 sm:$0xff]  }
  0x5d   : > { %2882 = vmatpush3.bf16.msra.mxu1 %v2987_v63  ;;  %863 = vperm.xlu1 %2971, %v821_v20   ;;  %v833_v44 = vld [vmem:[%s3431_s22 + $0x88] sm:$0xff]  ;;  %v834_v46 = vld [vmem:[%s3431_s22 + $0x90] sm:$0xff]  ;;  %v835_v49 = vld [vmem:[%s3431_s22 + $0x98] sm:$0xff]  ;;  %s2943_s13 = smul.u32 96, %s3827_s12  ;;  %s3686_s29 = scalar_lea.vmem %s3811_s6, %s2941_s26 }
  0x5e   : > { %2883 = vmatprep.subr.bf16.mxu1 %v2990_v2  ;;  %v3017_v47 = vld [vmem:[%s3423_s18 + $0x7c] ss:$12 sps:$4 sm:$0xff]   ;;  %v3032_v50 = vld [vmem:[%s3423_s18 + $0xe0] ss:$12 sps:$4 sm:$0xff]   ;;  %v3019_v53 = vld [vmem:[%s3423_s18 + $0x78] ss:$12 sps:$4 sm:$0xff]  }
  0x5f   : > { %2776 = vmatpush3.bf16.msra.mxu0 %v2988_v1  ;;  %v1652_v51 = vld [vmem:[%s3478_s27] sm:$0xff]  ;;  %v1653_v52 = vld [vmem:[%s3478_s27 + $0x8] sm:$0xff]  ;;  %v1654_v54 = vld [vmem:[%s3478_s27 + $0x10] sm:$0xff] }
  0x60   : > { %2777 = vmatprep.subr.bf16.mxu0 %v2989_v3  ;;  %868 = vperm.xlu0 %2970, %v822_v22   ;;  %v3020_v55 = vld [vmem:[%s3423_s18 + $0x94] ss:$12 sps:$4 sm:$0xff]   ;;  %v1655_v56 = vld [vmem:[%s3478_s27 + $0x18] sm:$0xff]  ;;  %v1657_v58 = vld [vmem:[%s3478_s27 + $0x28] sm:$0xff] }
  0x61   : > { %2884 = vmatpush3.bf16.msra.mxu1 %v2990_v2  ;;  %873 = vperm.xlu1 %2971, %v823_v24   ;;  %v1656_v57 = vld [vmem:[%s3478_s27 + $0x20] sm:$0xff]  ;;  %v3022_v59 = vld [vmem:[%s3423_s18 + $0x90] ss:$12 sps:$4 sm:$0xff]   ;;  %v3025_v61 = vld [vmem:[%s3423_s18 + $0xac] ss:$12 sps:$4 sm:$0xff]  }
  0x62   : > { %2885 = vmatprep.subr.bf16.mxu1 %v2993_v6  ;;  %v1658_v60 = vld [vmem:[%s3478_s27 + $0x30] sm:$0xff]  ;;  %v1659_v62 = vld [vmem:[%s3478_s27 + $0x38] sm:$0xff]  ;;  %v1660_v63 = vld [vmem:[%s3478_s27 + $0x40] sm:$0xff] }
  0x63   : > { %2778 = vmatpush3.bf16.msra.mxu0 %v2991_v4  ;;  %v1661_v0 = vld [vmem:[%s3478_s27 + $0x48] sm:$0xff]  ;;  %v1662_v2 = vld [vmem:[%s3478_s27 + $0x50] sm:$0xff]  ;;  %v1663_v4 = vld [vmem:[%s3478_s27 + $0x58] sm:$0xff] }
  0x64   : > { %2779 = vmatprep.subr.bf16.mxu0 %v2992_v5  ;;  %878 = vperm.xlu0 %2970, %v824_v26   ;;  %v3027_v1 = vld [vmem:[%s3423_s18 + $0xa8] ss:$12 sps:$4 sm:$0xff]   ;;  %v3028_v3 = vld [vmem:[%s3423_s18 + $0xc4] ss:$12 sps:$4 sm:$0xff]   ;;  %v3030_v7 = vld [vmem:[%s3423_s18 + $0xc0] ss:$12 sps:$4 sm:$0xff]  }
  0x65   : > { %2886 = vmatpush3.bf16.msra.mxu1 %v2993_v6  ;;  %883 = vperm.xlu1 %2971, %v825_v28   ;;  %v1664_v5 = vld [vmem:[%s3478_s27 + $0x60] sm:$0xff]  ;;  %v1665_v6 = vld [vmem:[%s3478_s27 + $0x68] sm:$0xff]  ;;  %v2092_v14 = vld [vmem:[%s3509_s11 + $0x10] sm:$0xff] }
  0x66   : > { %2887 = vmatprep.subr.bf16.mxu1 %v2998_v10  ;;  %v3033_v9 = vld [vmem:[%s3423_s18 + $0xdc] ss:$12 sps:$4 sm:$0xff]   ;;  %v2090_v11 = vld [vmem:[%s3509_s11] sm:$0xff]  ;;  %v2096_v18 = vld [vmem:[%s3509_s11 + $0x30] sm:$0xff] }
  0x67   : > { %2780 = vmatpush3.bf16.msra.mxu0 %v2994_v8  ;;  %v1666_v8 = vld [vmem:[%s3478_s27 + $0x70] sm:$0xff]  ;;  %v3035_v13 = vld [vmem:[%s3423_s18 + $0xd8] ss:$12 sps:$4 sm:$0xff]   ;;  %s722_s18 = scalar_lea.vmem %s3813_s8, %s2943_s13 }
  0x68   : > { %888 = vperm.xlu0 %2970, %v826_v30   ;;  %v2094_v16 = vld [vmem:[%s3509_s11 + $0x20] sm:$0xff]  ;;  %v2100_v22 = vld [vmem:[%s3509_s11 + $0x50] sm:$0xff] }
  0x69   : > { %2888 = vmatpush3.bf16.msra.mxu1 %v2998_v10  ;;  %893 = vperm.xlu1 %2971, %v827_v32   ;;  %v1667_v10 = vld [vmem:[%s3478_s27 + $0x78] sm:$0xff]  ;;  %v2098_v20 = vld [vmem:[%s3509_s11 + $0x40] sm:$0xff]  ;;  %v2377_v26 = vld [vmem:[%s722_s18 + $0x10] sm:$0xff] }
  0x6a   : > { %1273 = vmatmul.mubr.bf16.vlgmr.msra.gmra.mrb[0].mxu0 %v2995_v12  ;;  %1845 = vmatprep.subr.bf16.mxu1 %v3201_v48  ;;  %v2091_v12 = vld [vmem:[%s3509_s11 + $0x8] sm:$0xff]  ;;  %v2375_v24 = vld [vmem:[%s722_s18] sm:$0xff]  ;;  %v2381_v30 = vld [vmem:[%s722_s18 + $0x30] sm:$0xff] }
  0x6b   : > { %1280 = vmatprep.mubr.bf16.mxu0 %v3001_v15  ;;  %v2093_v15 = vld [vmem:[%s3509_s11 + $0x18] sm:$0xff]  ;;  %v2379_v28 = vld [vmem:[%s722_s18 + $0x20] sm:$0xff] }
  0x6c   : > { %2890 = vmatmul.mubr.bf16.vlgmr.msra.gmra.mrb[0].mxu1 %v3000_v17  ;;  %898 = vperm.xlu0 %2970, %v828_v34   ;;  %v2095_v17 = vld [vmem:[%s3509_s11 + $0x28] sm:$0xff]  ;;  %v2383_v32 = vld [vmem:[%s722_s18 + $0x40] sm:$0xff]  ;;  %v2385_v34 = vld [vmem:[%s722_s18 + $0x50] sm:$0xff] }
  0x6d   : > { %2893 = vmatprep.mubr.bf16.mxu1 %v3007_v19  ;;  %903 = vperm.xlu1 %2971, %v829_v36   ;;  %v2097_v19 = vld [vmem:[%s3509_s11 + $0x38] sm:$0xff]  ;;  %v3038_v36 = vld [vmem:[%s3533_s24 + $0x4] ss:$8 sps:$4 sm:$0xff]  }
  0x70   : > { %908 = vperm.xlu0 %2970, %v830_v38  }
  0x71   : > { %913 = vperm.xlu1 %2971, %v831_v40  }
  0x72   : > { %1281 = vmatmul.mubr.bf16.gmra.mrb[4].mxu0 %v3003_v21  ;;  %v2099_v21 = vld [vmem:[%s3509_s11 + $0x48] sm:$0xff] }
  0x73   : > { %1288 = vmatprep.mubr.bf16.mxu0 %v3004_v23  ;;  %v2101_v23 = vld [vmem:[%s3509_s11 + $0x58] sm:$0xff]  ;;  %s726_s11 = scalar_lea.vmem %s3814_s9, %s3833_s0 }
  0x74   : > { %2894 = vmatmul.mubr.bf16.gmra.mrb[4].mxu1 %v3008_v25  ;;  %918 = vperm.xlu0 %2970, %v832_v42   ;;  %v2376_v25 = vld [vmem:[%s722_s18 + $0x8] sm:$0xff] }
  0x75   : > { %2897 = vmatprep.mubr.bf16.mxu1 %v3015_v27  ;;  %923 = vperm.xlu1 %2971, %v833_v44   ;;  %v2378_v27 = vld [vmem:[%s722_s18 + $0x18] sm:$0xff] }
  0x78   : > { %928 = vperm.xlu0 %2970, %v834_v46  }
  0x79   : > { %933 = vperm.xlu1 %2971, %v835_v49  }
  0x7a   : > { %1289 = vmatmul.mubr.bf16.gmra.mrb[8].mxu0 %v3006_v29  ;;  %v2380_v29 = vld [vmem:[%s722_s18 + $0x28] sm:$0xff] }
  0x7b   : > { %1296 = vmatprep.mubr.bf16.mxu0 %v3009_v31  ;;  %v2382_v31 = vld [vmem:[%s722_s18 + $0x38] sm:$0xff] }
  0x7c   : > { %2898 = vmatmul.mubr.bf16.gmra.mrb[8].mxu1 %v3016_v33  ;;  %1670 = vperm.xlu0 %2970, %v1652_v51   ;;  %v2384_v33 = vld [vmem:[%s722_s18 + $0x48] sm:$0xff] }
  0x7d   : > { %2901 = vmatprep.mubr.bf16.mxu1 %v3023_v35  ;;  %1675 = vperm.xlu1 %2971, %v1653_v52   ;;  %v2386_v35 = vld [vmem:[%s722_s18 + $0x58] sm:$0xff] }
  0x80   : > { %1680 = vperm.xlu0 %2970, %v1654_v54  }
  0x81   : > { %1685 = vperm.xlu1 %2971, %v1655_v56  }
  0x82   : > { %1297 = vmatmul.mubr.bf16.gmra.mrb[12].mxu0 %v3011_v37 }
  0x83   : > { %1304 = vmatprep.mubr.bf16.mxu0 %v3012_v39 }
  0x84   : > { %2902 = vmatmul.mubr.bf16.gmra.mrb[12].mxu1 %v3024_v41  ;;  %1690 = vperm.xlu0 %2970, %v1656_v57  }
  0x85   : > { %2905 = vmatprep.mubr.bf16.mxu1 %v3031_v43  ;;  %1695 = vperm.xlu1 %2971, %v1657_v58  }
  0x88   : > { %1700 = vperm.xlu0 %2970, %v1658_v60  }
  0x89   : > { %1705 = vperm.xlu1 %2971, %v1659_v62  }
  0x8a   : > { %1305 = vmatmul.mubr.bf16.gmra.mrb[16].mxu0 %v3014_v45 }
  0x8b   : > { %1312 = vmatprep.mubr.bf16.mxu0 %v3017_v47 }
  0x8c   : > { %2906 = vmatmul.mubr.bf16.gmra.mrb[16].mxu1 %v3032_v50  ;;  %1710 = vperm.xlu0 %2970, %v1660_v63  }
  0x8d   : > { %1715 = vperm.xlu1 %2971, %v1661_v0   ;;  %2719 = vmatprep.mubr.msk.bf16.mxu1 %vm1820_vm0, %v3038_v36 }
  0x90   : > { %1720 = vperm.xlu0 %2970, %v1662_v2  }
  0x91   : > { %1725 = vperm.xlu1 %2971, %v1663_v4  }
  0x92   : > { %1313 = vmatmul.mubr.bf16.gmra.mrb[20].mxu0 %v3019_v53 }
  0x93   : > { %1320 = vmatprep.mubr.bf16.mxu0 %v3020_v55 }
  0x94   : > { %1730 = vperm.xlu0 %2970, %v1664_v5  }
  0x95   : > { %1735 = vperm.xlu1 %2971, %v1665_v6  }
  0x98   : > { %1740 = vperm.xlu0 %2970, %v1666_v8  }
  0x99   : > { %1745 = vperm.xlu1 %2971, %v1667_v10  }
  0x9a   : > { %1321 = vmatmul.mubr.bf16.gmra.mrb[24].mxu0 %v3022_v59 }
  0x9b   : > { %1328 = vmatprep.mubr.bf16.mxu0 %v3025_v61 }
  0x9c   : > { %2104 = vperm.xlu0 %2970, %v2090_v11  }
  0x9d   : > { %2109 = vperm.xlu1 %2971, %v2091_v12  }
  0xa0   : > { %2114 = vperm.xlu0 %2970, %v2092_v14  }
  0xa1   : > { %2119 = vperm.xlu1 %2971, %v2093_v15  }
  0xa2   : > { %1329 = vmatmul.mubr.bf16.gmra.mrb[28].mxu0 %v3027_v1 }
  0xa3   : > { %1336 = vmatprep.mubr.bf16.mxu0 %v3028_v3 }
  0xa4   : > { %2124 = vperm.xlu0 %2970, %v2094_v16  }
  0xa5   : > { %2129 = vperm.xlu1 %2971, %v2095_v17  }
  0xa8   : > { %2134 = vperm.xlu0 %2970, %v2096_v18  }
  0xa9   : > { %2139 = vperm.xlu1 %2971, %v2097_v19  }
  0xaa   : > { %1337 = vmatmul.mubr.bf16.gmra.mrb[32].mxu0 %v3030_v7 }
  0xab   : > { %1344 = vmatprep.mubr.bf16.mxu0 %v3033_v9 }
  0xac   : > { %2144 = vperm.xlu0 %2970, %v2098_v20  }
  0xad   : > { %2149 = vperm.xlu1 %2971, %v2099_v21  }
  0xb0   : > { %2154 = vperm.xlu0 %2970, %v2100_v22  }
  0xb1   : > { %2159 = vperm.xlu1 %2971, %v2101_v23  }
  0xb2   : > { %1345 = vmatmul.mubr.bf16.gmra.mrb[36].mxu0 %v3035_v13 }
  0xb4   : > { %2389 = vperm.xlu0 %2970, %v2375_v24  }
  0xb5   : > { %2394 = vperm.xlu1 %2971, %v2376_v25  }
  0xb8   : > { %2399 = vperm.xlu0 %2970, %v2377_v26  }
  0xb9   : > { %2404 = vperm.xlu1 %2971, %v2378_v27  }
  0xbc   : > { %2409 = vperm.xlu0 %2970, %v2379_v28  }
  0xbd   : > { %2414 = vperm.xlu1 %2971, %v2380_v29  }
  0xc0   : > { %2419 = vperm.xlu0 %2970, %v2381_v30  }
  0xc1   : > { %2424 = vperm.xlu1 %2971, %v2382_v31  }
  0xc4   : > { %2429 = vperm.xlu0 %2970, %v2383_v32  }
  0xc5   : > { %2434 = vperm.xlu1 %2971, %v2384_v33  }
  0xc8   : > { %2439 = vperm.xlu0 %2970, %v2385_v34  }
  0xc9   : > { %2444 = vperm.xlu1 %2971, %v2386_v35  }
  0xd3   : > { %v839_v37 = vpop.permute.xlu0 %838 }
  0xd4   : > { %v849_v53 = vpop.permute.xlu1 %848 }
  0xd7   : > { %v844_v47 = vpop.permute.xlu0 %843 }
  0xd8   : > { %v854_v5 = vpop.permute.xlu1 %853 }
  0xdb   : > { %v859_v15 = vpop.permute.xlu0 %858 }
  0xdc   : > { %v864_v27 = vpop.permute.xlu1 %863 }
 0x13d   : > { %v2781_v38 = vpop.f32.mrb[0].mxu0 }
 0x13e   : > { %v2782_v39 = vpop.f32.mrb[1].mxu0 }
 0x13f   : > { %v2783_v40 = vadd.f32 %v2782_v39, %v2781_v38  ;;  %v2784_v41 = vpop.f32.mrb[2].mxu0  ;;  %v2891_v43 = vpop.f32.mrb[0].mxu1 }
 0x140   : > { %v2785_v42 = vpop.f32.mrb[3].mxu0  ;;  %v1387_v46 = vpop.f32.mrb[1].mxu1 }
 0x141   : > { %v2786_v44 = vadd.f32 %v2785_v42, %v2784_v41  ;;  %v1275_v45 = vadd.f32 %v2783_v40, %v839_v37  ;;  %v2892_v49 = vpop.f32.mrb[2].mxu1  ;;  %v869_v40 = vpop.permute.xlu0 %868 }
 0x142   : > { %v1390_v52 = vpop.f32.mrb[3].mxu1 }
 0x143   : > { %v3537_v50 = vadd.f32 %v1387_v46, %v1275_v45  ;;  %v1278_v51 = vadd.f32 %v2786_v44, %v844_v47 }
 0x145   : > { %v1486_v54 = vmin.f32 %v3537_v50, 0.0  ;;  %v3540_v55 = vadd.f32 %v1390_v52, %v1278_v51  ;;  %v2787_v56 = vpop.f32.mrb[4].mxu0 }
 0x146   : > { %v2788_v57 = vpop.f32.mrb[5].mxu0 }
 0x147   : > { %v1506_v58 = vmul.f32 10.0, %v1486_v54  ;;  %v1487_v59 = vmin.f32 %v3540_v55, 0.0  ;;  %v2789_v60 = vadd.f32 %v2788_v57, %v2787_v56  ;;  %v2790_v61 = vpop.f32.mrb[6].mxu0  ;;  %v3543_v63 = vpop.f32.mrb[4].mxu1 }
 0x148   : > { %v2791_v62 = vpop.f32.mrb[7].mxu0  ;;  %v1403_v4 = vpop.f32.mrb[5].mxu1 }
 0x149   : > { %v1526_v0 = vmul.f32 1.442695, %v1506_v58  ;;  %v1507_v1 = vmul.f32 10.0, %v1487_v59  ;;  %v1283_v2 = vadd.f32 %v2789_v60, %v849_v53  ;;  %v2792_v3 = vadd.f32 %v2791_v62, %v2790_v61  ;;  %v3545_v6 = vpop.f32.mrb[6].mxu1  ;;  %v874_v57 = vpop.permute.xlu1 %873 }
 0x14a   : > { %v1406_v10 = vpop.f32.mrb[7].mxu1  ;;  %v1466_v58 = vmax.f32 %v3537_v50, 0.0  ;;  %v1467_v59 = vmax.f32 %v3540_v55, 0.0 }
 0x14b   : > { %3066 = vpow2.f32 %v1526_v0  ;;  %v1528_v7 = vmul.f32 1.442695, %v1507_v1  ;;  %v3547_v8 = vadd.f32 %v2891_v43, %v1283_v2  ;;  %v1286_v9 = vadd.f32 %v2792_v3, %v854_v5 }
 0x14d   : > { %3068 = vpow2.f32 %v1528_v7  ;;  %v1488_v11 = vmin.f32 %v3547_v8, 0.0  ;;  %v3550_v12 = vadd.f32 %v2892_v49, %v1286_v9  ;;  %v2793_v13 = vpop.f32.mrb[8].mxu0 }
 0x14e   : > { %v2794_v14 = vpop.f32.mrb[9].mxu0 }
 0x14f   : > { %v1508_v16 = vmul.f32 10.0, %v1488_v11  ;;  %v1489_v17 = vmin.f32 %v3550_v12, 0.0  ;;  %v2795_v18 = vadd.f32 %v2794_v14, %v2793_v13  ;;  %v2796_v19 = vpop.f32.mrb[10].mxu0  ;;  %v3553_v21 = vpop.f32.mrb[8].mxu1 }
 0x150   : > { %v2797_v20 = vpop.f32.mrb[11].mxu0  ;;  %v3555_v26 = vpop.f32.mrb[9].mxu1 }
 0x151   : > { %v1530_v22 = vmul.f32 1.442695, %v1508_v16  ;;  %v1509_v23 = vmul.f32 10.0, %v1489_v17  ;;  %v2798_v24 = vadd.f32 %v2797_v20, %v2796_v19  ;;  %v1291_v25 = vadd.f32 %v2795_v18, %v859_v15  ;;  %v3557_v28 = vpop.f32.mrb[10].mxu1  ;;  %v879_v14 = vpop.permute.xlu0 %878 }
 0x152   : > { %v3561_v32 = vpop.f32.mrb[11].mxu1 }
 0x153   : > { %3070 = vpow2.f32 %v1530_v22  ;;  %v1532_v29 = vmul.f32 1.442695, %v1509_v23  ;;  %v3559_v30 = vadd.f32 %v1403_v4, %v1291_v25  ;;  %v1294_v31 = vadd.f32 %v2798_v24, %v864_v27 }
 0x155   : > { %v3067_v33 = vpop.eup %3066  ;;  %3072 = vpow2.f32 %v1532_v29  ;;  %v1490_v34 = vmin.f32 %v3559_v30, 0.0  ;;  %v3564_v35 = vadd.f32 %v1406_v10, %v1294_v31  ;;  %v2799_v36 = vpop.f32.mrb[12].mxu0  ;;  %v1468_v31 = vmax.f32 %v3547_v8, 0.0 }
 0x156   : > { %v2683_v37 = vadd.f32 -1.0, %v3067_v33  ;;  %v2800_v38 = vpop.f32.mrb[13].mxu0  ;;  %v884_v29 = vpop.permute.xlu1 %883  ;;  %v1469_v33 = vmax.f32 %v3550_v12, 0.0 }
 0x157   : > { %v3069_v39 = vpop.eup %3068  ;;  %v1510_v41 = vmul.f32 10.0, %v1490_v34  ;;  %v1491_v42 = vmin.f32 %v3564_v35, 0.0  ;;  %v2801_v43 = vadd.f32 %v2800_v38, %v2799_v36  ;;  %v2802_v44 = vpop.f32.mrb[14].mxu0 }
 0x158   : > { %v1586_v45 = vmul.f32 0.1, %v2683_v37  ;;  %v2684_v46 = vadd.f32 -1.0, %v3069_v39  ;;  %v2803_v47 = vpop.f32.mrb[15].mxu0  ;;  %v3567_v49 = vpop.f32.mrb[12].mxu1 }
 0x159   : > { %v1534_v51 = vmul.f32 1.442695, %v1510_v41  ;;  %v1511_v52 = vmul.f32 10.0, %v1491_v42  ;;  %v1299_v53 = vadd.f32 %v2801_v43, %v869_v40  ;;  %v2804_v54 = vadd.f32 %v2803_v47, %v2802_v44  ;;  %v3569_v56 = vpop.f32.mrb[13].mxu1 }
 0x15a   : > { %v1587_v60 = vmul.f32 0.1, %v2684_v46  ;;  %v3573_v61 = vpop.f32.mrb[14].mxu1  ;;  %v1606_v3 = vadd.f32 %v1586_v45, %v1466_v58 }
 0x15b   : > { %3074 = vpow2.f32 %v1534_v51  ;;  %v1536_v62 = vmul.f32 1.442695, %v1511_v52  ;;  %v3576_v0 = vadd.f32 %v3543_v63, %v1299_v53  ;;  %v1302_v1 = vadd.f32 %v2804_v54, %v874_v57  ;;  %v3578_v2 = vpop.f32.mrb[15].mxu1  ;;  %v889_v57 = vpop.permute.xlu0 %888 }
 0x15c   : > { %v1607_v4 = vadd.f32 %v1587_v60, %v1467_v59 }
 0x15d   : > { %v3071_v5 = vpop.eup %3070  ;;  %3076 = vpow2.f32 %v1536_v62  ;;  %v1492_v7 = vmin.f32 %v3576_v0, 0.0  ;;  %v3582_v50 = vadd.f32 %v3545_v6, %v1302_v1  ;;  %v2805_v55 = vpop.f32.mrb[16].mxu0 }
 0x15e   : > { %v1642_v9 = vpack.c.bf16 %v1607_v4, %v1606_v3  ;;  %v2685_v10 = vadd.f32 -1.0, %v3071_v5  ;;  %v2806_v11 = vpop.f32.mrb[17].mxu0  ;;  %v894_v4 = vpop.permute.xlu1 %893  ;;  %v1470_v5 = vmax.f32 %v3559_v30, 0.0 }
 0x15f   : > { %v3073_v13 = vpop.eup %3072  ;;  %v1512_v63 = vmul.f32 10.0, %v1492_v7  ;;  %v1493_v15 = vmin.f32 %v3582_v50, 0.0  ;;  %v2807_v16 = vadd.f32 %v2806_v11, %v2805_v55  ;;  %v2808_v17 = vpop.f32.mrb[18].mxu0  ;;  %v1471_v7 = vmax.f32 %v3564_v35, 0.0 }
 0x160   : > { %v1588_v18 = vmul.f32 0.1, %v2685_v10  ;;  %v2686_v19 = vadd.f32 -1.0, %v3073_v13  ;;  %v2809_v20 = vpop.f32.mrb[19].mxu0  ;;  %1846 = vmatpush1.bf16.msra.mxu1 %v1642_v9  ;;  %v3585_v22 = vpop.f32.mrb[16].mxu1 }
 0x161   : > { %v1538_v23 = vmul.f32 1.442695, %v1512_v63  ;;  %v1513_v6 = vmul.f32 10.0, %v1493_v15  ;;  %v2810_v24 = vadd.f32 %v2809_v20, %v2808_v17  ;;  %v1307_v25 = vadd.f32 %v2807_v16, %v879_v14  ;;  %1847 = vmatprep.subr.bf16.mxu1 %v3201_v48  ;;  %v3588_v27 = vpop.f32.mrb[17].mxu1 }
 0x162   : > { %v1589_v34 = vmul.f32 0.1, %v2686_v19  ;;  %v3592_v36 = vpop.f32.mrb[18].mxu1  ;;  %v1608_v41 = vadd.f32 %v1588_v18, %v1468_v31 }
 0x163   : > { %3078 = vpow2.f32 %v1538_v23  ;;  %v1540_v37 = vmul.f32 1.442695, %v1513_v6  ;;  %v3595_v38 = vadd.f32 %v3555_v26, %v1307_v25  ;;  %v1310_v39 = vadd.f32 %v2810_v24, %v884_v29  ;;  %v3597_v40 = vpop.f32.mrb[19].mxu1  ;;  %v899_v24 = vpop.permute.xlu0 %898 }
 0x164   : > { %v1609_v42 = vadd.f32 %v1589_v34, %v1469_v33 }
 0x165   : > { %v3075_v43 = vpop.eup %3074  ;;  %3080 = vpow2.f32 %v1540_v37  ;;  %v1494_v44 = vmin.f32 %v3595_v38, 0.0  ;;  %v3601_v8 = vadd.f32 %v3561_v32, %v1310_v39  ;;  %v2811_v12 = vpop.f32.mrb[20].mxu0 }
 0x166   : > { %v2687_v45 = vadd.f32 -1.0, %v3075_v43  ;;  %v2812_v46 = vpop.f32.mrb[21].mxu0  ;;  %v1643_v47 = vpack.c.bf16 %v1609_v42, %v1608_v41  ;;  %v904_v39 = vpop.permute.xlu1 %903  ;;  %v1472_v41 = vmax.f32 %v3576_v0, 0.0  ;;  %v1473_v42 = vmax.f32 %v3582_v50, 0.0 }
 0x167   : > { %v3077_v51 = vpop.eup %3076  ;;  %v1514_v52 = vmul.f32 10.0, %v1494_v44  ;;  %v1495_v26 = vmin.f32 %v3601_v8, 0.0  ;;  %v2813_v53 = vadd.f32 %v2812_v46, %v2811_v12  ;;  %v2814_v54 = vpop.f32.mrb[22].mxu0 }
 0x168   : > { %v1590_v58 = vmul.f32 0.1, %v2687_v45  ;;  %v2688_v59 = vadd.f32 -1.0, %v3077_v51  ;;  %v2815_v60 = vpop.f32.mrb[23].mxu0  ;;  %1848 = vmatpush1.bf16.msra.mxu1 %v1643_v47 }
 0x169   : > { %v1542_v62 = vmul.f32 1.442695, %v1514_v52  ;;  %v1515_v1 = vmul.f32 10.0, %v1495_v26  ;;  %v1315_v3 = vadd.f32 %v2813_v53, %v889_v57  ;;  %v2816_v32 = vadd.f32 %v2815_v60, %v2814_v54  ;;  %1849 = vmatprep.subr.bf16.mxu1 %v3201_v48 }
 0x16a   : > { %v1591_v55 = vmul.f32 0.1, %v2688_v59  ;;  %v1610_v13 = vadd.f32 %v1590_v58, %v1470_v5 }
 0x16b   : > { %3082 = vpow2.f32 %v1542_v62  ;;  %v1544_v9 = vmul.f32 1.442695, %v1515_v1  ;;  %v3608_v10 = vadd.f32 %v3553_v21, %v1315_v3  ;;  %v1318_v11 = vadd.f32 %v2816_v32, %v894_v4  ;;  %v909_v62 = vpop.permute.xlu0 %908 }
 0x16c   : > { %v1611_v14 = vadd.f32 %v1591_v55, %v1471_v7  ;;  %v914_v55 = vpop.permute.xlu1 %913 }
 0x16d   : > { %v3079_v63 = vpop.eup %3078  ;;  %3084 = vpow2.f32 %v1544_v9  ;;  %v1496_v15 = vmin.f32 %v3608_v10, 0.0  ;;  %v3612_v16 = vadd.f32 %v3557_v28, %v1318_v11  ;;  %v2817_v17 = vpop.f32.mrb[24].mxu0  ;;  %v1474_v9 = vmax.f32 %v3595_v38, 0.0 }
 0x16e   : > { %v1644_v30 = vpack.c.bf16 %v1611_v14, %v1610_v13  ;;  %v2689_v18 = vadd.f32 -1.0, %v3079_v63  ;;  %v2818_v35 = vpop.f32.mrb[25].mxu0  ;;  %v1475_v11 = vmax.f32 %v3601_v8, 0.0 }
 0x16f   : > { %v3081_v19 = vpop.eup %3080  ;;  %v1516_v20 = vmul.f32 10.0, %v1496_v15  ;;  %v1497_v23 = vmin.f32 %v3612_v16, 0.0  ;;  %v2819_v21 = vadd.f32 %v2818_v35, %v2817_v17  ;;  %v2820_v6 = vpop.f32.mrb[26].mxu0 }
 0x170   : > { %v1592_v25 = vmul.f32 0.1, %v2689_v18  ;;  %v2690_v29 = vadd.f32 -1.0, %v3081_v19  ;;  %v2821_v31 = vpop.f32.mrb[27].mxu0  ;;  %1850 = vmatpush1.bf16.msra.mxu1 %v1644_v30 }
 0x171   : > { %v1546_v33 = vmul.f32 1.442695, %v1516_v20  ;;  %v1517_v34 = vmul.f32 10.0, %v1497_v23  ;;  %v2822_v37 = vadd.f32 %v2821_v31, %v2820_v6  ;;  %v1323_v28 = vadd.f32 %v2819_v21, %v899_v24  ;;  %1851 = vmatprep.subr.bf16.mxu1 %v3201_v48 }
 0x172   : > { %v1593_v43 = vmul.f32 0.1, %v2690_v29  ;;  %v1612_v46 = vadd.f32 %v1592_v25, %v1472_v41  ;;  %v919_v29 = vpop.permute.xlu0 %918  ;;  %v924_v41 = vpop.permute.xlu1 %923 }
 0x173   : > { %3086 = vpow2.f32 %v1546_v33  ;;  %v1548_v44 = vmul.f32 1.442695, %v1517_v34  ;;  %v3619_v12 = vadd.f32 %v3569_v56, %v1323_v28  ;;  %v1326_v45 = vadd.f32 %v2822_v37, %v904_v39 }
 0x174   : > { %v1613_v47 = vadd.f32 %v1593_v43, %v1473_v42  ;;  %v1476_v42 = vmax.f32 %v3608_v10, 0.0  ;;  %v1477_v43 = vmax.f32 %v3612_v16, 0.0 }
 0x175   : > { %v3083_v51 = vpop.eup %3082  ;;  %3088 = vpow2.f32 %v1548_v44  ;;  %v1498_v52 = vmin.f32 %v3619_v12, 0.0  ;;  %v3623_v26 = vadd.f32 %v3578_v2, %v1326_v45  ;;  %v2823_v53 = vpop.f32.mrb[28].mxu0 }
 0x176   : > { %v2691_v0 = vadd.f32 -1.0, %v3083_v51  ;;  %v2824_v54 = vpop.f32.mrb[29].mxu0  ;;  %v1645_v50 = vpack.c.bf16 %v1613_v47, %v1612_v46 }
 0x177   : > { %v3085_v57 = vpop.eup %3084  ;;  %v1518_v58 = vmul.f32 10.0, %v1498_v52  ;;  %v1499_v59 = vmin.f32 %v3623_v26, 0.0  ;;  %v2825_v56 = vadd.f32 %v2824_v54, %v2823_v53  ;;  %v2826_v60 = vpop.f32.mrb[30].mxu0 }
 0x178   : > { %v1594_v1 = vmul.f32 0.1, %v2691_v0  ;;  %v2692_v3 = vadd.f32 -1.0, %v3085_v57  ;;  %v2827_v32 = vpop.f32.mrb[31].mxu0  ;;  %1852 = vmatpush1.bf16.msra.mxu1 %v1645_v50 }
 0x179   : > { %v1550_v4 = vmul.f32 1.442695, %v1518_v58  ;;  %v1519_v5 = vmul.f32 10.0, %v1499_v59  ;;  %v1331_v7 = vadd.f32 %v2825_v56, %v909_v62  ;;  %v2828_v2 = vadd.f32 %v2827_v32, %v2826_v60  ;;  %1853 = vmatprep.subr.bf16.mxu1 %v3201_v48  ;;  %v929_v62 = vpop.permute.xlu0 %928 }
 0x17a   : > { %v1595_v13 = vmul.f32 0.1, %v2692_v3  ;;  %v1614_v17 = vadd.f32 %v1594_v1, %v1474_v9  ;;  %v1479_v9 = vmax.f32 %v3623_v26, 0.0 }
 0x17b   : > { %3090 = vpow2.f32 %v1550_v4  ;;  %v1552_v14 = vmul.f32 1.442695, %v1519_v5  ;;  %v3630_v63 = vadd.f32 %v3567_v49, %v1331_v7  ;;  %v1334_v15 = vadd.f32 %v2828_v2, %v914_v55  ;;  %v934_v2 = vpop.permute.xlu1 %933 }
 0x17c   : > { %v1615_v30 = vadd.f32 %v1595_v13, %v1475_v11  ;;  %v1478_v55 = vmax.f32 %v3619_v12, 0.0 }
 0x17d   : > { %v3087_v18 = vpop.eup %3086  ;;  %3092 = vpow2.f32 %v1552_v14  ;;  %v1500_v35 = vmin.f32 %v3630_v63, 0.0  ;;  %v3634_v19 = vadd.f32 %v3573_v61, %v1334_v15  ;;  %v2829_v20 = vpop.f32.mrb[32].mxu0 }
 0x17e   : > { %v1646_v38 = vpack.c.bf16 %v1615_v30, %v1614_v17  ;;  %v2693_v23 = vadd.f32 -1.0, %v3087_v18  ;;  %v2830_v8 = vpop.f32.mrb[33].mxu0 }
 0x17f   : > { %v3089_v21 = vpop.eup %3088  ;;  %v1520_v6 = vmul.f32 10.0, %v1500_v35  ;;  %v1501_v24 = vmin.f32 %v3634_v19, 0.0  ;;  %v2831_v49 = vadd.f32 %v2830_v8, %v2829_v20  ;;  %v2832_v25 = vpop.f32.mrb[34].mxu0 }
 0x180   : > { %v1596_v31 = vmul.f32 0.1, %v2693_v23  ;;  %v2694_v33 = vadd.f32 -1.0, %v3089_v21  ;;  %v2833_v34 = vpop.f32.mrb[35].mxu0  ;;  %1854 = vmatpush1.bf16.msra.mxu1 %v1646_v38 }
 0x181   : > { %v1554_v37 = vmul.f32 1.442695, %v1520_v6  ;;  %v1521_v28 = vmul.f32 10.0, %v1501_v24  ;;  %v2834_v39 = vadd.f32 %v2833_v34, %v2832_v25  ;;  %v1339_v61 = vadd.f32 %v2831_v49, %v919_v29  ;;  %1855 = vmatprep.subr.bf16.mxu1 %v3201_v48 }
 0x182   : > { %v1597_v44 = vmul.f32 0.1, %v2694_v33  ;;  %v1616_v51 = vadd.f32 %v1596_v31, %v1476_v42  ;;  %v1481_v25 = vmax.f32 %v3634_v19, 0.0 }
 0x183   : > { %3094 = vpow2.f32 %v1554_v37  ;;  %v1556_v45 = vmul.f32 1.442695, %v1521_v28  ;;  %v3641_v46 = vadd.f32 %v3588_v27, %v1339_v61  ;;  %v1342_v47 = vadd.f32 %v2834_v39, %v924_v41 }
 0x184   : > { %v1617_v52 = vadd.f32 %v1597_v44, %v1477_v43 }
 0x185   : > { %v3091_v53 = vpop.eup %3090  ;;  %3096 = vpow2.f32 %v1556_v45  ;;  %v1502_v0 = vmin.f32 %v3641_v46, 0.0  ;;  %v3645_v54 = vadd.f32 %v3597_v40, %v1342_v47  ;;  %v2835_v50 = vpop.f32.mrb[36].mxu0  ;;  %v1482_v42 = vmax.f32 %v3641_v46, 0.0 }
 0x186   : > { %v2695_v10 = vadd.f32 -1.0, %v3091_v53  ;;  %v2836_v57 = vpop.f32.mrb[37].mxu0  ;;  %v1647_v16 = vpack.c.bf16 %v1617_v52, %v1616_v51 }
 0x187   : > { %v3093_v58 = vpop.eup %3092  ;;  %v1522_v59 = vmul.f32 10.0, %v1502_v0  ;;  %v1503_v56 = vmin.f32 %v3645_v54, 0.0  ;;  %v2837_v27 = vadd.f32 %v2836_v57, %v2835_v50  ;;  %v2838_v60 = vpop.f32.mrb[38].mxu0 }
 0x188   : > { %v1598_v1 = vmul.f32 0.1, %v2695_v10  ;;  %v2696_v3 = vadd.f32 -1.0, %v3093_v58  ;;  %v2839_v32 = vpop.f32.mrb[39].mxu0  ;;  %1856 = vmatpush1.bf16.msra.mxu1 %v1647_v16  ;;  %v3036_v58 = vld [vmem:[%s3533_s24] ss:$8 sps:$4 sm:$0xff]  }
 0x189   : > { %v1558_v4 = vmul.f32 1.442695, %v1522_v59  ;;  %v1523_v5 = vmul.f32 10.0, %v1503_v56  ;;  %v1347_v7 = vadd.f32 %v2837_v27, %v929_v62  ;;  %v2840_v40 = vadd.f32 %v2839_v32, %v2838_v60  ;;  %1857 = vmatprep.subr.bf16.mxu1 %v3201_v48  ;;  %v3039_v59 = vld [vmem:[%s3533_s24 + $0x14] ss:$8 sps:$4 sm:$0xff]  }
 0x18a   : > { %v1599_v11 = vmul.f32 0.1, %v2696_v3  ;;  %v1618_v17 = vadd.f32 %v1598_v1, %v1478_v55  ;;  %v3041_v56 = vld [vmem:[%s3533_s24 + $0x10] ss:$8 sps:$4 sm:$0xff]   ;;  %v3044_v27 = vld [vmem:[%s3533_s24 + $0x20] ss:$8 sps:$4 sm:$0xff]  }
 0x18b   : > { %3098 = vpow2.f32 %v1558_v4  ;;  %v1560_v13 = vmul.f32 1.442695, %v1523_v5  ;;  %v1460_v14 = vadd.f32 %v3585_v22, %v1347_v7  ;;  %v1350_v15 = vadd.f32 %v2840_v40, %v934_v2  ;;  %v3045_v60 = vld [vmem:[%s3533_s24 + $0x34] ss:$8 sps:$4 sm:$0xff]   ;;  %v3047_v62 = vld [vmem:[%s3533_s24 + $0x30] ss:$8 sps:$4 sm:$0xff]  }
 0x18c   : > { %v1619_v30 = vadd.f32 %v1599_v11, %v1479_v9  ;;  %v1480_v22 = vmax.f32 %v3630_v63, 0.0  ;;  %v1483_v63 = vmax.f32 %v3645_v54, 0.0  ;;  %v3048_v1 = vld [vmem:[%s3533_s24 + $0x44] ss:$8 sps:$4 sm:$0xff]   ;;  %v3050_v3 = vld [vmem:[%s3533_s24 + $0x40] ss:$8 sps:$4 sm:$0xff]   ;;  %v1671_v9 = vpop.permute.xlu0 %1670 }
 0x18d   : > { %v3095_v18 = vpop.eup %3094  ;;  %3100 = vpow2.f32 %v1560_v13  ;;  %v1504_v35 = vmin.f32 %v1460_v14, 0.0  ;;  %v1463_v20 = vadd.f32 %v3592_v36, %v1350_v15  ;;  %v1484_v46 = vmax.f32 %v1460_v14, 0.0  ;;  %v3051_v32 = vld [vmem:[%s3533_s24 + $0x54] ss:$8 sps:$4 sm:$0xff]   ;;  %v3053_v4 = vld [vmem:[%s3533_s24 + $0x50] ss:$8 sps:$4 sm:$0xff]   ;;  %v1676_v15 = vpop.permute.xlu1 %1675 }
 0x18e   : > { %v1648_v38 = vpack.c.bf16 %v1619_v30, %v1618_v17  ;;  %v2697_v23 = vadd.f32 -1.0, %v3095_v18  ;;  %v3054_v5 = vld [vmem:[%s3533_s24 + $0x64] ss:$8 sps:$4 sm:$0xff]   ;;  %v3056_v7 = vld [vmem:[%s3533_s24 + $0x60] ss:$8 sps:$4 sm:$0xff]  }
 0x18f   : > { %v3097_v8 = vpop.eup %3096  ;;  %v1524_v21 = vmul.f32 10.0, %v1504_v35  ;;  %v1505_v12 = vmin.f32 %v1463_v20, 0.0  ;;  %v1485_v54 = vmax.f32 %v1463_v20, 0.0  ;;  %v3057_v40 = vld [vmem:[%s3533_s24 + $0x74] ss:$8 sps:$4 sm:$0xff]   ;;  %v3060_v55 = vld [vmem:[%s3686_s29] sm:$0xff]  }
 0x190   : > { %v1600_v6 = vmul.f32 0.1, %v2697_v23  ;;  %v2698_v26 = vadd.f32 -1.0, %v3097_v8  ;;  %1858 = vmatpush1.bf16.msra.mxu1 %v1648_v38  ;;  %v3059_v2 = vld [vmem:[%s3533_s24 + $0x70] ss:$8 sps:$4 sm:$0xff]   ;;  %2925 = vmatprep.mubr.bf16.mxu0 %v3060_v55 }
 0x191   : > { %v1562_v24 = vmul.f32 1.442695, %v1524_v21  ;;  %v1525_v49 = vmul.f32 10.0, %v1505_v12  ;;  %1859 = vmatprep.subr.bf16.mxu1 %v3201_v48  ;;  %v1681_v21 = vpop.permute.xlu0 %1680 }
 0x192   : > { %v1601_v29 = vmul.f32 0.1, %v2698_v26  ;;  %v1620_v36 = vadd.f32 %v1600_v6, %v1480_v22 }
 0x193   : > { %3102 = vpow2.f32 %v1562_v24  ;;  %v1564_v31 = vmul.f32 1.442695, %v1525_v49  ;;  %v1686_v49 = vpop.permute.xlu1 %1685 }
 0x194   : > { %v1621_v33 = vadd.f32 %v1601_v29, %v1481_v25 }
 0x195   : > { %v3099_v34 = vpop.eup %3098  ;;  %3104 = vpow2.f32 %v1564_v31 }
 0x196   : > { %v2699_v37 = vadd.f32 -1.0, %v3099_v34  ;;  %v1649_v28 = vpack.c.bf16 %v1621_v33, %v1620_v36 }
 0x197   : > { %v3101_v39 = vpop.eup %3100 }
 0x198   : > { %v1602_v61 = vmul.f32 0.1, %v2699_v37  ;;  %v2700_v41 = vadd.f32 -1.0, %v3101_v39  ;;  %1860 = vmatpush1.bf16.msra.mxu1 %v1649_v28  ;;  %v1691_v28 = vpop.permute.xlu0 %1690 }
 0x199   : > { %1861 = vmatprep.subr.bf16.mxu1 %v3201_v48 }
 0x19a   : > { %v1603_v19 = vmul.f32 0.1, %v2700_v41  ;;  %v1622_v43 = vadd.f32 %v1602_v61, %v1482_v42 }
 0x19c   : > { %v1623_v44 = vadd.f32 %v1603_v19, %v1483_v63  ;;  %v1696_v63 = vpop.permute.xlu1 %1695 }
 0x19d   : > { %v3103_v45 = vpop.eup %3102 }
 0x19e   : > { %v1650_v47 = vpack.c.bf16 %v1623_v44, %v1622_v43  ;;  %v2701_v51 = vadd.f32 -1.0, %v3103_v45 }
 0x19f   : > { %v3105_v52 = vpop.eup %3104 }
 0x1a0   : > { %v1604_v53 = vmul.f32 0.1, %v2701_v51  ;;  %v2702_v0 = vadd.f32 -1.0, %v3105_v52  ;;  %1862 = vmatpush1.bf16.msra.mxu1 %v1650_v47 }
 0x1a1   : > { %1863 = vmatprep.subr.bf16.mxu1 %v3201_v48  ;;  %v3042_v48 = vld [vmem:[%s3533_s24 + $0x24] ss:$8 sps:$4 sm:$0xff]  }
 0x1a2   : > { %v1605_v50 = vmul.f32 0.1, %v2702_v0  ;;  %v1624_v10 = vadd.f32 %v1604_v53, %v1484_v46 }
 0x1a4   : > { %v1625_v57 = vadd.f32 %v1605_v50, %v1485_v54 }
 0x1a6   : > { %v1651_v16 = vpack.c.bf16 %v1625_v57, %v1624_v10  ;;  %v1701_v57 = vpop.permute.xlu0 %1700 }
 0x1a8   : > { %1864 = vmatpush1.bf16.msra.mxu1 %v1651_v16 }
 0x1ab   : > { %1878 = vmatmul.mubr.bf16.vlgmr.msra.gmra.mrb[20].mxu1 %v3036_v58 }
 0x1ac   : > { %2720 = vmatprep.mubr.msk.bf16.mxu1 %vm1820_vm0, %v3039_v59 }
 0x1b3   : > { %1886 = vmatmul.mubr.bf16.gmra.mrb[24].mxu1 %v3041_v56 }
 0x1b4   : > { %2721 = vmatprep.mubr.msk.bf16.mxu1 %vm1820_vm0, %v3042_v48 }
 0x1bb   : > { %1894 = vmatmul.mubr.bf16.gmra.mrb[28].mxu1 %v3044_v27 }
 0x1bc   : > { %2722 = vmatprep.mubr.msk.bf16.mxu1 %vm1820_vm0, %v3045_v60 }
 0x1c3   : > { %1902 = vmatmul.mubr.bf16.gmra.mrb[32].mxu1 %v3047_v62  ;;  %v1706_v62 = vpop.permute.xlu1 %1705 }
 0x1c4   : > { %2723 = vmatprep.mubr.msk.bf16.mxu1 %vm1820_vm0, %v3048_v1 }
 0x1cb   : > { %1910 = vmatmul.mubr.bf16.gmra.mrb[36].mxu1 %v3050_v3 }
 0x1cc   : > { %2724 = vmatprep.mubr.msk.bf16.mxu1 %vm1820_vm0, %v3051_v32 }
 0x1d3   : > { %1918 = vmatmul.mubr.bf16.gmra.mrb[40].mxu1 %v3053_v4 }
 0x1d4   : > { %2725 = vmatprep.mubr.msk.bf16.mxu1 %vm1820_vm0, %v3054_v5 }
 0x1db   : > { %1926 = vmatmul.mubr.bf16.gmra.mrb[44].mxu1 %v3056_v7 }
 0x1dc   : > { %2726 = vmatprep.mubr.msk.bf16.mxu1 %vm1820_vm0, %v3057_v40 }
 0x1e3   : > { %1934 = vmatmul.mubr.bf16.gmra.mrb[48].mxu1 %v3059_v2 }
 0x27e   : > { %v1879_v11 = vpop.f32.mrb[20].mxu1 }
 0x27f   : > { %v1880_v13 = vadd.f32 %v1879_v11, %v1671_v9  ;;  %v1881_v14 = vpop.f32.mrb[21].mxu1 }
 0x280   : > { %v1882_v17 = vpop.f32.mrb[22].mxu1 }
 0x281   : > { %v1958_v30 = vmin.f32 %v1880_v13, 0.0  ;;  %v1883_v18 = vadd.f32 %v1882_v17, %v1676_v15  ;;  %v1884_v35 = vpop.f32.mrb[23].mxu1  ;;  %v1942_v16 = vmax.f32 %v1880_v13, 0.0 }
 0x283   : > { %v1974_v20 = vmul.f32 10.0, %v1958_v30  ;;  %v1959_v38 = vmin.f32 %v1883_v18, 0.0  ;;  %v1943_v58 = vmax.f32 %v1883_v18, 0.0  ;;  %v1711_v18 = vpop.permute.xlu0 %1710 }
 0x285   : > { %v1990_v23 = vmul.f32 1.442695, %v1974_v20  ;;  %v1975_v8 = vmul.f32 10.0, %v1959_v38 }
 0x286   : > { %v1887_v12 = vpop.f32.mrb[24].mxu1 }
 0x287   : > { %3106 = vpow2.f32 %v1990_v23  ;;  %v1992_v6 = vmul.f32 1.442695, %v1975_v8  ;;  %v3689_v26 = vadd.f32 %v1887_v12, %v1681_v21  ;;  %v1889_v24 = vpop.f32.mrb[25].mxu1 }
 0x288   : > { %v1890_v22 = vpop.f32.mrb[26].mxu1 }
 0x289   : > { %3108 = vpow2.f32 %v1992_v6  ;;  %v1960_v25 = vmin.f32 %v3689_v26, 0.0  ;;  %v3692_v29 = vadd.f32 %v1890_v22, %v1686_v49  ;;  %v1892_v31 = vpop.f32.mrb[27].mxu1  ;;  %v1944_v35 = vmax.f32 %v3689_v26, 0.0  ;;  %v1716_v6 = vpop.permute.xlu1 %1715 }
 0x28b   : > { %v1976_v36 = vmul.f32 10.0, %v1960_v25  ;;  %v1961_v33 = vmin.f32 %v3692_v29, 0.0  ;;  %v1945_v20 = vmax.f32 %v3692_v29, 0.0 }
 0x28d   : > { %v1994_v34 = vmul.f32 1.442695, %v1976_v36  ;;  %v1977_v37 = vmul.f32 10.0, %v1961_v33 }
 0x28e   : > { %v1895_v39 = vpop.f32.mrb[28].mxu1 }
 0x28f   : > { %3110 = vpow2.f32 %v1994_v34  ;;  %v1996_v61 = vmul.f32 1.442695, %v1977_v37  ;;  %v3695_v41 = vadd.f32 %v1895_v39, %v1691_v28  ;;  %v1897_v42 = vpop.f32.mrb[29].mxu1 }
 0x290   : > { %v1898_v19 = vpop.f32.mrb[30].mxu1 }
 0x291   : > { %v3107_v43 = vpop.eup %3106  ;;  %3112 = vpow2.f32 %v1996_v61  ;;  %v1962_v44 = vmin.f32 %v3695_v41, 0.0  ;;  %v3698_v45 = vadd.f32 %v1898_v19, %v1696_v63  ;;  %v1900_v47 = vpop.f32.mrb[31].mxu1 }
 0x292   : > { %v2727_v51 = vadd.f32 -1.0, %v3107_v43  ;;  %v1721_v19 = vpop.permute.xlu0 %1720  ;;  %v1946_v43 = vmax.f32 %v3695_v41, 0.0 }
 0x293   : > { %v3109_v52 = vpop.eup %3108  ;;  %v1978_v53 = vmul.f32 10.0, %v1962_v44  ;;  %v1963_v0 = vmin.f32 %v3698_v45, 0.0  ;;  %v1947_v44 = vmax.f32 %v3698_v45, 0.0 }
 0x294   : > { %v2038_v46 = vmul.f32 0.1, %v2727_v51  ;;  %v2728_v54 = vadd.f32 -1.0, %v3109_v52 }
 0x295   : > { %v1998_v50 = vmul.f32 1.442695, %v1978_v53  ;;  %v1979_v10 = vmul.f32 10.0, %v1963_v0 }
 0x296   : > { %v2039_v59 = vmul.f32 0.1, %v2728_v54  ;;  %v1903_v56 = vpop.f32.mrb[32].mxu1  ;;  %v2054_v1 = vadd.f32 %v2038_v46, %v1942_v16  ;;  %v1726_v46 = vpop.permute.xlu1 %1725 }
 0x297   : > { %3114 = vpow2.f32 %v1998_v50  ;;  %v2000_v48 = vmul.f32 1.442695, %v1979_v10  ;;  %v3701_v27 = vadd.f32 %v1903_v56, %v1701_v57  ;;  %v1905_v60 = vpop.f32.mrb[33].mxu1 }
 0x298   : > { %v2055_v3 = vadd.f32 %v2039_v59, %v1943_v58  ;;  %v1906_v32 = vpop.f32.mrb[34].mxu1 }
 0x299   : > { %v3111_v4 = vpop.eup %3110  ;;  %3116 = vpow2.f32 %v2000_v48  ;;  %v1964_v5 = vmin.f32 %v3701_v27, 0.0  ;;  %v3704_v7 = vadd.f32 %v1906_v32, %v1706_v62  ;;  %v1908_v40 = vpop.f32.mrb[35].mxu1 }
 0x29a   : > { %v2729_v2 = vadd.f32 -1.0, %v3111_v4  ;;  %v2082_v55 = vpack.c.bf16 %v2055_v3, %v2054_v1  ;;  %v1731_v4 = vpop.permute.xlu0 %1730 }
 0x29b   : > { %v3113_v9 = vpop.eup %3112  ;;  %v1980_v11 = vmul.f32 10.0, %v1964_v5  ;;  %v1965_v13 = vmin.f32 %v3704_v7, 0.0  ;;  %v1948_v5 = vmax.f32 %v3701_v27, 0.0  ;;  %v1949_v40 = vmax.f32 %v3704_v7, 0.0 }
 0x29c   : > { %v2040_v14 = vmul.f32 0.1, %v2729_v2  ;;  %v2730_v15 = vadd.f32 -1.0, %v3113_v9  ;;  %2909 = vmatprep.subr.bf16.mxu0 %v2082_v55 }
 0x29d   : > { %v2002_v17 = vmul.f32 1.442695, %v1980_v11  ;;  %v1981_v30 = vmul.f32 10.0, %v1965_v13  ;;  %2910 = vmatpush3.bf16.msra.mxu0 %v2082_v55 }
 0x29e   : > { %v2041_v38 = vmul.f32 0.1, %v2730_v15  ;;  %v1911_v23 = vpop.f32.mrb[36].mxu1  ;;  %v2056_v24 = vadd.f32 %v2040_v14, %v1944_v35  ;;  %v1736_v14 = vpop.permute.xlu1 %1735 }
 0x29f   : > { %3118 = vpow2.f32 %v2002_v17  ;;  %v2004_v8 = vmul.f32 1.442695, %v1981_v30  ;;  %v3709_v21 = vadd.f32 %v1911_v23, %v1711_v18  ;;  %v1913_v12 = vpop.f32.mrb[37].mxu1 }
 0x2a0   : > { %v2057_v49 = vadd.f32 %v2041_v38, %v1945_v20  ;;  %v1914_v22 = vpop.f32.mrb[38].mxu1 }
 0x2a1   : > { %v3115_v25 = vpop.eup %3114  ;;  %3120 = vpow2.f32 %v2004_v8  ;;  %v1966_v31 = vmin.f32 %v3709_v21, 0.0  ;;  %v3712_v36 = vadd.f32 %v1914_v22, %v1716_v6  ;;  %v1916_v26 = vpop.f32.mrb[39].mxu1 }
 0x2a2   : > { %v2731_v33 = vadd.f32 -1.0, %v3115_v25  ;;  %v2083_v29 = vpack.c.bf16 %v2057_v49, %v2056_v24  ;;  %v1741_v25 = vpop.permute.xlu0 %1740 }
 0x2a3   : > { %v3117_v34 = vpop.eup %3116  ;;  %v1982_v37 = vmul.f32 10.0, %v1966_v31  ;;  %v1967_v28 = vmin.f32 %v3712_v36, 0.0  ;;  %v1950_v31 = vmax.f32 %v3709_v21, 0.0  ;;  %v1951_v26 = vmax.f32 %v3712_v36, 0.0 }
 0x2a4   : > { %v2042_v39 = vmul.f32 0.1, %v2731_v33  ;;  %v2732_v61 = vadd.f32 -1.0, %v3117_v34  ;;  %2911 = vmatprep.subr.bf16.mxu0 %v2083_v29 }
 0x2a5   : > { %v2006_v42 = vmul.f32 1.442695, %v1982_v37  ;;  %v1983_v63 = vmul.f32 10.0, %v1967_v28  ;;  %2912 = vmatpush3.bf16.msra.mxu0 %v2083_v29 }
 0x2a6   : > { %v2043_v47 = vmul.f32 0.1, %v2732_v61  ;;  %v1919_v51 = vpop.f32.mrb[40].mxu1  ;;  %v2058_v54 = vadd.f32 %v2042_v39, %v1946_v43  ;;  %v1746_v39 = vpop.permute.xlu1 %1745 }
 0x2a7   : > { %3122 = vpow2.f32 %v2006_v42  ;;  %v2008_v52 = vmul.f32 1.442695, %v1983_v63  ;;  %v3717_v53 = vadd.f32 %v1919_v51, %v1721_v19  ;;  %v1921_v0 = vpop.f32.mrb[41].mxu1 }
 0x2a8   : > { %v2059_v50 = vadd.f32 %v2043_v47, %v1947_v44  ;;  %v1922_v10 = vpop.f32.mrb[42].mxu1 }
 0x2a9   : > { %v3119_v57 = vpop.eup %3118  ;;  %3124 = vpow2.f32 %v2008_v52  ;;  %v1968_v16 = vmin.f32 %v3717_v53, 0.0  ;;  %v3720_v58 = vadd.f32 %v1922_v10, %v1726_v46  ;;  %v1924_v41 = vpop.f32.mrb[43].mxu1 }
 0x2aa   : > { %v2733_v59 = vadd.f32 -1.0, %v3119_v57  ;;  %v2084_v45 = vpack.c.bf16 %v2059_v50, %v2058_v54  ;;  %v1952_v57 = vmax.f32 %v3717_v53, 0.0 }
 0x2ab   : > { %v3121_v56 = vpop.eup %3120  ;;  %v1984_v48 = vmul.f32 10.0, %v1968_v16  ;;  %v1969_v60 = vmin.f32 %v3720_v58, 0.0  ;;  %v1953_v16 = vmax.f32 %v3720_v58, 0.0 }
 0x2ac   : > { %v2044_v62 = vmul.f32 0.1, %v2733_v59  ;;  %v2734_v1 = vadd.f32 -1.0, %v3121_v56  ;;  %2913 = vmatprep.subr.bf16.mxu0 %v2084_v45 }
 0x2ad   : > { %v2010_v3 = vmul.f32 1.442695, %v1984_v48  ;;  %v1985_v32 = vmul.f32 10.0, %v1969_v60  ;;  %2914 = vmatpush3.bf16.msra.mxu0 %v2084_v45 }
 0x2ae   : > { %v2045_v2 = vmul.f32 0.1, %v2734_v1  ;;  %v1927_v55 = vpop.f32.mrb[44].mxu1  ;;  %v2060_v15 = vadd.f32 %v2044_v62, %v1948_v5 }
 0x2af   : > { %3126 = vpow2.f32 %v2010_v3  ;;  %v2012_v9 = vmul.f32 1.442695, %v1985_v32  ;;  %v3725_v11 = vadd.f32 %v1927_v55, %v1731_v4  ;;  %v1929_v13 = vpop.f32.mrb[45].mxu1 }
 0x2b0   : > { %v2061_v17 = vadd.f32 %v2045_v2, %v1949_v40  ;;  %v1930_v30 = vpop.f32.mrb[46].mxu1 }
 0x2b1   : > { %v3123_v18 = vpop.eup %3122  ;;  %3128 = vpow2.f32 %v2012_v9  ;;  %v1970_v35 = vmin.f32 %v3725_v11, 0.0  ;;  %v3728_v20 = vadd.f32 %v1930_v30, %v1736_v14  ;;  %v1932_v27 = vpop.f32.mrb[47].mxu1  ;;  %v1954_v4 = vmax.f32 %v3725_v11, 0.0 }
 0x2b2   : > { %v2735_v38 = vadd.f32 -1.0, %v3123_v18  ;;  %v2085_v7 = vpack.c.bf16 %v2061_v17, %v2060_v15  ;;  %v3061_v27 = vld [vmem:[%s3686_s29 + $0x8] sm:$0xff]  }
 0x2b3   : > { %v3125_v23 = vpop.eup %3124  ;;  %v1986_v8 = vmul.f32 10.0, %v1970_v35  ;;  %v1971_v12 = vmin.f32 %v3728_v20, 0.0  ;;  %v1955_v53 = vmax.f32 %v3728_v20, 0.0 }
 0x2b4   : > { %v2046_v6 = vmul.f32 0.1, %v2735_v38  ;;  %v2736_v24 = vadd.f32 -1.0, %v3125_v23  ;;  %2915 = vmatprep.subr.bf16.mxu0 %v2085_v7  ;;  %v3062_v38 = vld [vmem:[%s3686_s29 + $0x10] sm:$0xff]   ;;  %v3064_v23 = vld [vmem:[%s3686_s29 + $0x20] sm:$0xff]  }
 0x2b5   : > { %v2014_v49 = vmul.f32 1.442695, %v1986_v8  ;;  %v1987_v22 = vmul.f32 10.0, %v1971_v12  ;;  %2916 = vmatpush3.bf16.msra.mxu0 %v2085_v7  ;;  %v3063_v7 = vld [vmem:[%s3686_s29 + $0x18] sm:$0xff]   ;;  %v3065_v8 = vld [vmem:[%s3686_s29 + $0x28] sm:$0xff]   ;;  %v2105_v12 = vpop.permute.xlu0 %2104 }
 0x2b6   : > { %v2047_v33 = vmul.f32 0.1, %v2736_v24  ;;  %v1935_v29 = vpop.f32.mrb[48].mxu1  ;;  %v2062_v61 = vadd.f32 %v2046_v6, %v1950_v31  ;;  %v2110_v6 = vpop.permute.xlu1 %2109 }
 0x2b7   : > { %3130 = vpow2.f32 %v2014_v49  ;;  %v2016_v34 = vmul.f32 1.442695, %v1987_v22  ;;  %v1936_v37 = vadd.f32 %v1935_v29, %v1741_v25  ;;  %v1937_v28 = vpop.f32.mrb[49].mxu1 }
 0x2b8   : > { %v2063_v42 = vadd.f32 %v2047_v33, %v1951_v26  ;;  %v1938_v63 = vpop.f32.mrb[50].mxu1 }
 0x2b9   : > { %v3127_v19 = vpop.eup %3126  ;;  %3132 = vpow2.f32 %v2016_v34  ;;  %v1972_v43 = vmin.f32 %v1936_v37, 0.0  ;;  %v1939_v44 = vadd.f32 %v1938_v63, %v1746_v39  ;;  %v1940_v47 = vpop.f32.mrb[51].mxu1  ;;  %v1956_v17 = vmax.f32 %v1936_v37, 0.0 }
 0x2ba   : > { %v2737_v51 = vadd.f32 -1.0, %v3127_v19  ;;  %v2086_v52 = vpack.c.bf16 %v2063_v42, %v2062_v61  ;;  %v2115_v24 = vpop.permute.xlu0 %2114  ;;  %v2120_v49 = vpop.permute.xlu1 %2119 }
 0x2bb   : > { %v3129_v21 = vpop.eup %3128  ;;  %v1988_v0 = vmul.f32 10.0, %v1972_v43  ;;  %v1973_v36 = vmin.f32 %v1939_v44, 0.0  ;;  %v1957_v11 = vmax.f32 %v1939_v44, 0.0 }
 0x2bc   : > { %v2048_v46 = vmul.f32 0.1, %v2737_v51  ;;  %v2738_v54 = vadd.f32 -1.0, %v3129_v21  ;;  %2917 = vmatprep.subr.bf16.mxu0 %v2086_v52 }
 0x2bd   : > { %v2018_v50 = vmul.f32 1.442695, %v1988_v0  ;;  %v1989_v10 = vmul.f32 10.0, %v1973_v36  ;;  %2918 = vmatpush3.bf16.msra.mxu0 %v2086_v52 }
 0x2be   : > { %v2049_v41 = vmul.f32 0.1, %v2738_v54  ;;  %v2064_v45 = vadd.f32 %v2048_v46, %v1952_v57  ;;  %v2125_v22 = vpop.permute.xlu0 %2124  ;;  %v2130_v25 = vpop.permute.xlu1 %2129 }
 0x2bf   : > { %3134 = vpow2.f32 %v2018_v50  ;;  %v2020_v59 = vmul.f32 1.442695, %v1989_v10 }
 0x2c0   : > { %v2065_v56 = vadd.f32 %v2049_v41, %v1953_v16 }
 0x2c1   : > { %v3131_v48 = vpop.eup %3130  ;;  %3136 = vpow2.f32 %v2020_v59 }
 0x2c2   : > { %v2739_v60 = vadd.f32 -1.0, %v3131_v48  ;;  %v2087_v62 = vpack.c.bf16 %v2065_v56, %v2064_v45  ;;  %v2135_v31 = vpop.permute.xlu0 %2134  ;;  %v2140_v42 = vpop.permute.xlu1 %2139 }
 0x2c3   : > { %v3133_v1 = vpop.eup %3132 }
 0x2c4   : > { %v2050_v3 = vmul.f32 0.1, %v2739_v60  ;;  %v2740_v32 = vadd.f32 -1.0, %v3133_v1  ;;  %2919 = vmatprep.subr.bf16.mxu0 %v2087_v62 }
 0x2c5   : > { %2920 = vmatpush3.bf16.msra.mxu0 %v2087_v62 }
 0x2c6   : > { %v2051_v5 = vmul.f32 0.1, %v2740_v32  ;;  %v2066_v58 = vadd.f32 %v2050_v3, %v1954_v4  ;;  %v2145_v47 = vpop.permute.xlu0 %2144  ;;  %v2150_v16 = vpop.permute.xlu1 %2149 }
 0x2c8   : > { %v2067_v40 = vadd.f32 %v2051_v5, %v1955_v53 }
 0x2c9   : > { %v3135_v2 = vpop.eup %3134 }
 0x2ca   : > { %v2741_v55 = vadd.f32 -1.0, %v3135_v2  ;;  %v2088_v9 = vpack.c.bf16 %v2067_v40, %v2066_v58  ;;  %v2155_v62 = vpop.permute.xlu0 %2154  ;;  %v2160_v2 = vpop.permute.xlu1 %2159 }
 0x2cb   : > { %v3137_v13 = vpop.eup %3136 }
 0x2cc   : > { %v2052_v14 = vmul.f32 0.1, %v2741_v55  ;;  %v2742_v15 = vadd.f32 -1.0, %v3137_v13  ;;  %2921 = vmatprep.subr.bf16.mxu0 %v2088_v9 }
 0x2cd   : > { %2922 = vmatpush3.bf16.msra.mxu0 %v2088_v9 }
 0x2ce   : > { %v2053_v30 = vmul.f32 0.1, %v2742_v15  ;;  %v2068_v18 = vadd.f32 %v2052_v14, %v1956_v17 }
 0x2d0   : > { %v2069_v35 = vadd.f32 %v2053_v30, %v1957_v11  ;;  %v2390_v11 = vpop.permute.xlu0 %2389 }
 0x2d2   : > { %v2089_v20 = vpack.c.bf16 %v2069_v35, %v2068_v18 }
 0x2d4   : > { %2923 = vmatprep.subr.bf16.mxu0 %v2089_v20 }
 0x2d5   : > { %2924 = vmatpush3.bf16.msra.mxu0 %v2089_v20 }
 0x2d8   : > { %2926 = vmatmul.mubr.bf16.vlgmr.msra.gmra.mrb[40].mxu0 %v3061_v27 }
 0x2d9   : > { %2929 = vmatprep.mubr.bf16.mxu0 %v3062_v38 }
 0x2e0   : > { %2930 = vmatmul.mubr.bf16.gmra.mrb[44].mxu0 %v3063_v7 }
 0x2e1   : > { %2933 = vmatprep.mubr.bf16.mxu0 %v3064_v23 }
 0x2e8   : > { %2934 = vmatmul.mubr.bf16.gmra.mrb[48].mxu0 %v3065_v8 }
 0x3ab   : > { %v2927_v26 = vpop.f32.mrb[40].mxu0 }
 0x3ac   : > { %v3742_v33 = vadd.f32 %v2927_v26, %v2115_v24  ;;  %v2232_v29 = vpop.f32.mrb[41].mxu0  ;;  %v2395_v26 = vpop.permute.xlu1 %2394 }
 0x3ad   : > { %v3744_v34 = vadd.f32 %v2232_v29, %v2105_v12  ;;  %v2928_v37 = vpop.f32.mrb[42].mxu0 }
 0x3ae   : > { %v2293_v28 = vmin.f32 %v3742_v33, 0.0  ;;  %v3747_v39 = vadd.f32 %v2928_v37, %v2120_v49  ;;  %v2235_v61 = vpop.f32.mrb[43].mxu0 }
 0x3af   : > { %v2291_v63 = vmin.f32 %v3744_v34, 0.0  ;;  %v3750_v19 = vadd.f32 %v2235_v61, %v2110_v6  ;;  %v2279_v24 = vmax.f32 %v3744_v34, 0.0 }
 0x3b0   : > { %v2305_v43 = vmul.f32 10.0, %v2293_v28  ;;  %v2294_v44 = vmin.f32 %v3747_v39, 0.0 }
 0x3b1   : > { %v2303_v51 = vmul.f32 10.0, %v2291_v63  ;;  %v2292_v52 = vmin.f32 %v3750_v19, 0.0  ;;  %v2280_v34 = vmax.f32 %v3750_v19, 0.0 }
 0x3b2   : > { %v2319_v21 = vmul.f32 1.442695, %v2305_v43  ;;  %v2306_v0 = vmul.f32 10.0, %v2294_v44 }
 0x3b3   : > { %v2315_v36 = vmul.f32 1.442695, %v2303_v51  ;;  %v2304_v46 = vmul.f32 10.0, %v2292_v52  ;;  %v2931_v54 = vpop.f32.mrb[44].mxu0  ;;  %v2281_v51 = vmax.f32 %v3742_v33, 0.0 }
 0x3b4   : > { %3138 = vpow2.f32 %v2319_v21  ;;  %v2321_v50 = vmul.f32 1.442695, %v2306_v0  ;;  %v3754_v10 = vadd.f32 %v2931_v54, %v2135_v31  ;;  %v2248_v57 = vpop.f32.mrb[45].mxu0 }
 0x3b5   : > { %3140 = vpow2.f32 %v2315_v36  ;;  %v2317_v41 = vmul.f32 1.442695, %v2304_v46  ;;  %v3756_v59 = vadd.f32 %v2248_v57, %v2125_v22  ;;  %v2932_v45 = vpop.f32.mrb[46].mxu0 }
 0x3b6   : > { %3142 = vpow2.f32 %v2321_v50  ;;  %v2297_v56 = vmin.f32 %v3754_v10, 0.0  ;;  %v3759_v48 = vadd.f32 %v2932_v45, %v2140_v42  ;;  %v2251_v60 = vpop.f32.mrb[47].mxu0  ;;  %v2282_v50 = vmax.f32 %v3747_v39, 0.0 }
 0x3b7   : > { %3144 = vpow2.f32 %v2317_v41  ;;  %v2295_v1 = vmin.f32 %v3756_v59, 0.0  ;;  %v3762_v3 = vadd.f32 %v2251_v60, %v2130_v25  ;;  %v2283_v39 = vmax.f32 %v3756_v59, 0.0 }
 0x3b8   : > { %v2309_v32 = vmul.f32 10.0, %v2297_v56  ;;  %v2298_v4 = vmin.f32 %v3759_v48, 0.0  ;;  %v2405_v56 = vpop.permute.xlu1 %2404 }
 0x3b9   : > { %v2307_v53 = vmul.f32 10.0, %v2295_v1  ;;  %v2296_v5 = vmin.f32 %v3762_v3, 0.0 }
 0x3ba   : > { %v2327_v58 = vmul.f32 1.442695, %v2309_v32  ;;  %v2310_v40 = vmul.f32 10.0, %v2298_v4 }
 0x3bb   : > { %v2323_v55 = vmul.f32 1.442695, %v2307_v53  ;;  %v2308_v9 = vmul.f32 10.0, %v2296_v5  ;;  %v2935_v13 = vpop.f32.mrb[48].mxu0 }
 0x3bc   : > { %3146 = vpow2.f32 %v2327_v58  ;;  %v2329_v14 = vmul.f32 1.442695, %v2310_v40  ;;  %v3766_v15 = vadd.f32 %v2935_v13, %v2155_v62  ;;  %v2264_v17 = vpop.f32.mrb[49].mxu0 }
 0x3bd   : > { %3148 = vpow2.f32 %v2323_v55  ;;  %v2325_v30 = vmul.f32 1.442695, %v2308_v9  ;;  %v3768_v18 = vadd.f32 %v2264_v17, %v2145_v47  ;;  %v2936_v35 = vpop.f32.mrb[50].mxu0  ;;  %v2400_v47 = vpop.permute.xlu0 %2399 }
 0x3be   : > { %v3139_v20 = vpop.eup %3138  ;;  %3150 = vpow2.f32 %v2329_v14  ;;  %v2301_v27 = vmin.f32 %v3766_v15, 0.0  ;;  %v3771_v38 = vadd.f32 %v2936_v35, %v2160_v2  ;;  %v2267_v7 = vpop.f32.mrb[51].mxu0  ;;  %v2284_v35 = vmax.f32 %v3762_v3, 0.0 }
 0x3bf   : > { %v3141_v23 = vpop.eup %3140  ;;  %v2751_v8 = vadd.f32 -1.0, %v3139_v20  ;;  %3152 = vpow2.f32 %v2325_v30  ;;  %v2299_v12 = vmin.f32 %v3768_v18, 0.0  ;;  %v3776_v61 = vadd.f32 %v2267_v7, %v2150_v16 }
 0x3c0   : > { %v3143_v6 = vpop.eup %3142  ;;  %v2749_v49 = vadd.f32 -1.0, %v3141_v23  ;;  %v2313_v22 = vmul.f32 10.0, %v2301_v27  ;;  %v2302_v25 = vmin.f32 %v3771_v38, 0.0  ;;  %v2285_v30 = vmax.f32 %v3754_v10, 0.0  ;;  %v2415_v23 = vpop.permute.xlu1 %2414 }
 0x3c1   : > { %v3145_v31 = vpop.eup %3144  ;;  %v2353_v29 = vmul.f32 0.1, %v2751_v8  ;;  %v2752_v37 = vadd.f32 -1.0, %v3143_v6  ;;  %v2311_v28 = vmul.f32 10.0, %v2299_v12  ;;  %v2300_v57 = vmin.f32 %v3776_v61, 0.0  ;;  %v2410_v5 = vpop.permute.xlu0 %2409 }
 0x3c2   : > { %v2351_v42 = vmul.f32 0.1, %v2749_v49  ;;  %v2750_v63 = vadd.f32 -1.0, %v3145_v31  ;;  %v2335_v43 = vmul.f32 1.442695, %v2313_v22  ;;  %v2314_v44 = vmul.f32 10.0, %v2302_v25 }
 0x3c3   : > { %v2354_v52 = vmul.f32 0.1, %v2752_v37  ;;  %v2331_v21 = vmul.f32 1.442695, %v2311_v28  ;;  %v2365_v54 = vadd.f32 %v2353_v29, %v2281_v51  ;;  %v2312_v62 = vmul.f32 10.0, %v2300_v57 }
 0x3c4   : > { %v2363_v0 = vadd.f32 %v2351_v42, %v2279_v24  ;;  %v2352_v36 = vmul.f32 0.1, %v2750_v63  ;;  %3154 = vpow2.f32 %v2335_v43  ;;  %v2337_v46 = vmul.f32 1.442695, %v2314_v44  ;;  %v2425_v44 = vpop.permute.xlu1 %2424 }
 0x3c5   : > { %3156 = vpow2.f32 %v2331_v21  ;;  %v2366_v60 = vadd.f32 %v2354_v52, %v2282_v50  ;;  %v2449_v58 = vmul.f32 %v2400_v47, %v2365_v54  ;;  %v2333_v2 = vmul.f32 1.442695, %v2312_v62  ;;  %v2420_v25 = vpop.permute.xlu0 %2419 }
 0x3c6   : > { %v3147_v16 = vpop.eup %3146  ;;  %v2364_v41 = vadd.f32 %v2352_v36, %v2280_v34  ;;  %3158 = vpow2.f32 %v2337_v46  ;;  %v2447_v1 = vmul.f32 %v2390_v11, %v2363_v0  ;;  %v2286_v8 = vmax.f32 %v3759_v48, 0.0 }
 0x3c7   : > { %v3149_v45 = vpop.eup %3148  ;;  %v2755_v33 = vadd.f32 -1.0, %v3147_v16  ;;  %v2450_v17 = vmul.f32 %v2405_v56, %v2366_v60  ;;  %3160 = vpow2.f32 %v2333_v2  ;;  %v2287_v37 = vmax.f32 %v3768_v18, 0.0 }
 0x3c8   : > { %v3151_v19 = vpop.eup %3150  ;;  %v2448_v32 = vmul.f32 %v2395_v26, %v2364_v41  ;;  %v2753_v4 = vadd.f32 -1.0, %v3149_v45  ;;  %v2289_v50 = vmax.f32 %v3766_v15, 0.0  ;;  %v2288_v18 = vmax.f32 %v3776_v61, 0.0  ;;  %v2435_v45 = vpop.permute.xlu1 %2434 }
 0x3c9   : > { %v3153_v53 = vpop.eup %3152  ;;  %v2756_v40 = vadd.f32 -1.0, %v3151_v19  ;;  %v2357_v9 = vmul.f32 0.1, %v2755_v33  ;;  %v2430_v21 = vpop.permute.xlu0 %2429  ;;  %v2290_v60 = vmax.f32 %v3771_v38, 0.0 }
 0x3ca   : > { %v2459_v55 = vadd.f32 %v2448_v32, %v2447_v1  ;;  %v2355_v13 = vmul.f32 0.1, %v2753_v4  ;;  %v2754_v14 = vadd.f32 -1.0, %v3153_v53 }
 0x3cb   : > { %v2358_v27 = vmul.f32 0.1, %v2756_v40  ;;  %v2369_v12 = vadd.f32 %v2357_v9, %v2285_v30 }
 0x3cc   : > { %v2460_v11 = vadd.f32 %v2459_v55, %v2449_v58  ;;  %v2367_v20 = vadd.f32 %v2355_v13, %v2283_v39  ;;  %v2356_v7 = vmul.f32 0.1, %v2754_v14  ;;  %v2445_v53 = vpop.permute.xlu1 %2444 }
 0x3cd   : > { %v2370_v26 = vadd.f32 %v2358_v27, %v2286_v8  ;;  %v2453_v28 = vmul.f32 %v2420_v25, %v2369_v12  ;;  %v2440_v1 = vpop.permute.xlu0 %2439 }
 0x3ce   : > { %v3155_v59 = vpop.eup %3154  ;;  %v2451_v6 = vmul.f32 %v2410_v5, %v2367_v20  ;;  %v2461_v24 = vadd.f32 %v2460_v11, %v2450_v17  ;;  %v2368_v49 = vadd.f32 %v2356_v7, %v2284_v35 }
 0x3cf   : > { %v3157_v22 = vpop.eup %3156  ;;  %v2759_v63 = vadd.f32 -1.0, %v3155_v59  ;;  %v2454_v48 = vmul.f32 %v2425_v44, %v2370_v26 }
 0x3d0   : > { %v2462_v31 = vadd.f32 %v2461_v24, %v2451_v6  ;;  %v2452_v10 = vmul.f32 %v2415_v23, %v2368_v49  ;;  %v2757_v29 = vadd.f32 -1.0, %v3157_v22  ;;  %v3159_v3 = vpop.eup %3158 }
 0x3d1   : > { %v2760_v52 = vadd.f32 -1.0, %v3159_v3  ;;  %v3161_v34 = vpop.eup %3160  ;;  %v2361_v0 = vmul.f32 0.1, %v2759_v63 }
 0x3d2   : > { %v2463_v42 = vadd.f32 %v2462_v31, %v2452_v10  ;;  %v2359_v43 = vmul.f32 0.1, %v2757_v29  ;;  %v2758_v54 = vadd.f32 -1.0, %v3161_v34 }
 0x3d3   : > { %v2362_v16 = vmul.f32 0.1, %v2760_v52  ;;  %v2373_v56 = vadd.f32 %v2361_v0, %v2289_v50 }
 0x3d4   : > { %v2464_v47 = vadd.f32 %v2463_v42, %v2453_v28  ;;  %v2371_v51 = vadd.f32 %v2359_v43, %v2287_v37  ;;  %v2360_v41 = vmul.f32 0.1, %v2758_v54 }
 0x3d5   : > { %v2374_v62 = vadd.f32 %v2362_v16, %v2290_v60  ;;  %v2457_v32 = vmul.f32 %v2440_v1, %v2373_v56 }
 0x3d6   : > { %v2455_v36 = vmul.f32 %v2430_v21, %v2371_v51  ;;  %v2465_v46 = vadd.f32 %v2464_v47, %v2454_v48  ;;  %v2372_v33 = vadd.f32 %v2360_v41, %v2288_v18 }
 0x3d7   : > { %v2458_v5 = vmul.f32 %v2445_v53, %v2374_v62 }
 0x3d8   : > { %v2466_v57 = vadd.f32 %v2465_v46, %v2455_v36  ;;  %v2456_v19 = vmul.f32 %v2435_v45, %v2372_v33 }
 0x3da   : > { %v2467_v4 = vadd.f32 %v2466_v57, %v2456_v19 }
 0x3dc   : > { %v2468_v15 = vadd.f32 %v2467_v4, %v2457_v32 }
 0x3de   : > { %v2469_v58 = vadd.f32 %v2468_v15, %v2458_v5 }
 0x3e0   : > { %v2470_v39 = vrot.slane %v2469_v58, 4 }
 0x3e2   : > { %v2471_v61 = vadd.f32 %v2470_v39, %v2469_v58 }
 0x3e4   : > { %v2472_v40 = vrot.slane %v2471_v61, 2 }
 0x3e6   : > { %v2473_v2 = vadd.f32 %v2472_v40, %v2471_v61 }
 0x3e8   : > { %v2474_v55 = vrot.slane %v2473_v2, 1 }
 0x3ea   : > { %v2475_v38 = vadd.f32 %v2474_v55, %v2473_v2 }
 0x3ec   : > { %2476 = vst [vmem:[%s726_s11] sm:$0x1] %v2475_v38 }
 0x3ed PF: > { %p22_p7 = scmp.ge.s32.totalorder %s3274_s17, 7   ;;  %s3815_s14 = smov %s3194_s15 }
 0x3ee   : > { %s3816_s15 = smov %s3283_s20  ;;  %s3817_s16 = smov %s3274_s17 }
 0x3ef   :  { %24 = sbr.rel (!%p22_p7) target bundleno = 17 (0x11), region = 149 }

</bundles_post_ra>
